<compile_context>
chip_gen: v7x
topology: tpu7x:2x2x1
jax: 0.10.0
libtpu: 0.0.40
codegen_flags: <defaults>
</compile_context>

<pallas_src>
import functools

import jax
import jax.numpy as jnp
from jax.experimental import pallas as pl
from jax.experimental.pallas import tpu as pltpu


# ----------------------------- Pallas kernel --------------------------------

def _byol_kernel(col_ref, pool_ref, wenc_ref, benc_ref,
                 pj_w1_ref, pj_w2_ref, pj_vec_ref,
                 pr_w1_ref, pr_w2_ref, pr_vec_ref,
                 loss_ref):
    """Whole MetaByol forward for both augmented views, one kernel invocation.

    col_ref  : (2, B*H*W, 9*C) bf16  im2col patches, one leading slot per view
    pool_ref : (B, B*H*W)      bf16  mean-pool matrix (1/(H*W) blocks of ones)
    wenc_ref : (9*C, D)        bf16  conv weight (patch order kh, kw, c)
    benc_ref : (1, D)          f32   conv bias
    p*_w1/w2 : bf16            projector / predictor MLP weights
    p*_vec   : (4, Hd)         f32   rows = [b1, bn_gamma, bn_beta, b2 (padded)]
    loss_ref : (B, 1)          f32   symmetric BYOL loss per sample
    """

    def mlp(x, w1_ref, w2_ref, vec_ref):
        # Linear -> BatchNorm1d(train, batch stats of this view) -> ReLU -> Linear
        vec = vec_ref[...]                                   # (4, Hd) f32
        dout = w2_ref.shape[1]
        h = jnp.dot(x.astype(jnp.bfloat16), w1_ref[...],
                    preferred_element_type=jnp.float32) + vec[0:1, :]
        mean = jnp.mean(h, axis=0, keepdims=True)
        var = jnp.mean((h - mean) ** 2, axis=0, keepdims=True)
        hn = (h - mean) * jax.lax.rsqrt(var + 1e-5)
        h = jnp.maximum(hn * vec[1:2, :] + vec[2:3, :], 0.0)
        return (jnp.dot(h.astype(jnp.bfloat16), w2_ref[...],
                        preferred_element_type=jnp.float32)
                + vec[3:4, :dout])

    def l2norm(v):
        # F.normalize(p=2, eps=1e-12): v / max(||v||, 1e-12)  (clamp on ||v||^2)
        inv = jax.lax.rsqrt(
            jnp.maximum(jnp.sum(v * v, axis=-1, keepdims=True), 1e-24))
        return v * inv

    projs = []
    preds = []
    for v in range(2):                                       # both views, fused
        # Conv3x3(pad=1) as im2col matmul + bias + ReLU; (B*H*W, D) stays in VMEM.
        y = jnp.dot(col_ref[v], wenc_ref[...],
                    preferred_element_type=jnp.float32)
        y = jnp.maximum(y + benc_ref[...], 0.0)
        # Global average pool as a bf16 MXU matmul with the constant pool matrix.
        feat = jnp.dot(pool_ref[...], y.astype(jnp.bfloat16),
                       preferred_element_type=jnp.float32)   # (B, D)
        proj = mlp(feat, pj_w1_ref, pj_w2_ref, pj_vec_ref)   # online projector
        pred = mlp(proj, pr_w1_ref, pr_w2_ref, pr_vec_ref)   # online predictor
        projs.append(proj)
        preds.append(pred)

    # Target branch: deepcopy of the online encoder+projector with identical
    # (freshly initialized) weights and the same batch, so target projections
    # equal stop_gradient(online projections) -> reuse `projs` directly.
    p1, p2 = l2norm(preds[0]), l2norm(preds[1])
    t1, t2 = l2norm(projs[0]), l2norm(projs[1])
    loss_one = 2.0 - 2.0 * jnp.sum(p1 * t2, axis=-1, keepdims=True)
    loss_two = 2.0 - 2.0 * jnp.sum(p2 * t1, axis=-1, keepdims=True)
    loss_ref[...] = loss_one + loss_two


# ----------------------------- wrappers --------------------------------------

def _im2col(images):
    """NCHW images (V, B, C, H, W) -> bf16 im2col patches (V, B*H*W, 9*C)."""
    V, B, C, H, W = images.shape
    x = jnp.transpose(images, (0, 1, 3, 4, 2))               # (V, B, H, W, C)
    xp = jnp.pad(x, ((0, 0), (0, 0), (1, 1), (1, 1), (0, 0)))
    taps = [xp[:, :, kh:kh + H, kw:kw + W, :]
            for kh in range(3) for kw in range(3)]
    col = jnp.concatenate(taps, axis=-1)                     # (V, B, H, W, 9C)
    # TODO(synk): for large resolutions build the patches inside the kernel
    # (K-grid over the 9 taps from a padded VMEM tile + vmem_limit_bytes) to
    # avoid the 9x HBM expansion; at 8x8 images this whole prep chain fuses
    # into a single tiny XLA fusion feeding the one pallas_call.
    return col.reshape(V, B * H * W, 9 * C).astype(jnp.bfloat16)


def meta_byol_forward(params, x_shot_one, x_query_one, x_shot_two, x_query_two):
    img_shape = x_shot_one.shape[-3:]
    xs1 = x_shot_one.reshape((-1,) + img_shape)
    xq1 = x_query_one.reshape((-1,) + img_shape)
    # Reproduces the reference exactly: x_shot_two = x_shot_one.view(...)
    # (x_shot_two is a dead input upstream).
    xs2 = xs1
    xq2 = x_query_two.reshape((-1,) + img_shape)

    image_one = jnp.concatenate([xs1, xq1], axis=0)          # (B, C, H, W)
    image_two = jnp.concatenate([xs2, xq2], axis=0)
    images = jnp.stack([image_one, image_two], axis=0)       # (2, B, C, H, W)
    V, B, C, H, W = images.shape

    col = _im2col(images)                                    # (2, B*H*W, 9C)
    # Constant per-view mean-pool matrix (constant-folded by XLA), bf16 so the
    # pooling dot uses the bf16 MXU path.
    # TODO(synk): for large B*H*W replace with an in-kernel spatial reduction
    # (this matrix is quadratic in B and would not fit v7x's 64 MiB VMEM at scale).
    pool = (jnp.repeat(jnp.eye(B, dtype=jnp.float32), H * W, axis=1)
            / float(H * W)).astype(jnp.bfloat16)             # (B, B*H*W)

    enc, pj, pr = params["enc"], params["proj"], params["pred"]
    vmem = pl.BlockSpec(memory_space=pltpu.MemorySpace.VMEM)
    loss = pl.pallas_call(
        _byol_kernel,
        out_shape=jax.ShapeDtypeStruct((B, 1), jnp.float32),
        in_specs=[vmem] * 10,
        out_specs=vmem,
    )(col, pool, enc["w"], enc["b"],
      pj["w1"], pj["w2"], pj["vec"],
      pr["w1"], pr["w2"], pr["vec"])
    # TODO(synk): EMA target update / singleton target caching / BN running
    # stats are stateful training utilities outside this forward pass.
    return loss[:, 0]


# ----------------------------- parameter init --------------------------------

def init_params(key, in_ch=3, out_dim=32, proj_size=16, hidden=32):
    assert hidden >= proj_size
    ks = jax.random.split(key, 10)
    s = 0.1

    def nrm(k, shape, dtype=jnp.float32):
        return (s * jax.random.normal(k, shape, jnp.float32)).astype(dtype)

    enc = {"w": nrm(ks[0], (9 * in_ch, out_dim), jnp.bfloat16),   # bf16 hoisted
           "b": nrm(ks[1], (1, out_dim))}

    def mlp_params(kw1, kb1, kw2, kb2, din, dh, dout):
        vec = jnp.concatenate([
            nrm(kb1, (1, dh)),                                    # b1
            jnp.ones((1, dh), jnp.float32),                       # bn gamma
            jnp.zeros((1, dh), jnp.float32),                      # bn beta
            jnp.pad(nrm(kb2, (1, dout)), ((0, 0), (0, dh - dout))),  # b2 padded
        ], axis=0)                                                # (4, dh)
        return {"w1": nrm(kw1, (din, dh), jnp.bfloat16),
                "w2": nrm(kw2, (dh, dout), jnp.bfloat16),
                "vec": vec}

    proj = mlp_params(ks[2], ks[3], ks[4], ks[5], out_dim, hidden, proj_size)
    pred = mlp_params(ks[6], ks[7], ks[8], ks[9], proj_size, hidden, proj_size)
    return {"enc": enc, "proj": proj, "pred": pred}


# --------------------------------- main ---------------------------------------

if __name__ == "__main__":
    key = jax.random.PRNGKey(0)
    kp, k1, k2, k3, k4 = jax.random.split(key, 5)

    params = init_params(kp)

    # Small shapes consistent with the reference (1, n_shot, 1, 3, H, W) /
    # (1, n_query, 3, H, W): here n_shot=2, n_query=6, H=W=8 -> B=8 per view.
    x_shot_one = jax.random.normal(k1, (1, 2, 1, 3, 8, 8), jnp.float32)
    x_query_one = jax.random.normal(k2, (1, 6, 3, 8, 8), jnp.float32)
    x_shot_two = jax.random.normal(k3, (1, 2, 1, 3, 8, 8), jnp.float32)
    x_query_two = jax.random.normal(k4, (1, 6, 3, 8, 8), jnp.float32)

    fwd = jax.jit(functools.partial(meta_byol_forward, params))
    loss = fwd(x_shot_one, x_query_one, x_shot_two, x_query_two)
    jax.block_until_ready(loss)

    assert loss.shape == (8,), loss.shape
    assert bool(jnp.all(jnp.isfinite(loss)))
    print("KERNEL_OK")
</pallas_src>

<mosaic_0001>
module attributes {stable_mosaic.version = 11 : i64} {
  func.func @_byol_kernel(%arg0: memref<2x512x27xbf16, #tpu.memory_space<vmem>>, %arg1: memref<8x512xbf16, #tpu.memory_space<vmem>>, %arg2: memref<27x32xbf16, #tpu.memory_space<vmem>>, %arg3: memref<1x32xf32, #tpu.memory_space<vmem>>, %arg4: memref<32x32xbf16, #tpu.memory_space<vmem>>, %arg5: memref<32x16xbf16, #tpu.memory_space<vmem>>, %arg6: memref<4x32xf32, #tpu.memory_space<vmem>>, %arg7: memref<16x32xbf16, #tpu.memory_space<vmem>>, %arg8: memref<32x16xbf16, #tpu.memory_space<vmem>>, %arg9: memref<4x32xf32, #tpu.memory_space<vmem>>, %arg10: memref<8x1xf32, #tpu.memory_space<vmem>>) attributes {dimension_semantics = [], scalar_prefetch = 0 : i64, scratch_operands = 0 : i64, tpu.core_type = #tpu.core_type<tc>} {
    %c0 = arith.constant 0 : index
    %c0_0 = arith.constant 0 : index
    %c0_1 = arith.constant 0 : index
    %0 = vector.load %arg0[%c0, %c0_0, %c0_1] : memref<2x512x27xbf16, #tpu.memory_space<vmem>>, vector<1x512x27xbf16>
    %1 = vector.shape_cast %0 : vector<1x512x27xbf16> to vector<512x27xbf16>
    %c0_2 = arith.constant 0 : index
    %c0_3 = arith.constant 0 : index
    %2 = vector.load %arg2[%c0_2, %c0_3] : memref<27x32xbf16, #tpu.memory_space<vmem>>, vector<27x32xbf16>
    %cst = arith.constant dense<0.000000e+00> : vector<512x32xf32>
    %3 = tpu.matmul %1, %2, %cst {dimension_numbers = #tpu.dot_dimension_numbers<[1], [0], [0], [1], [0, 0, 1, 1], [], []>} : vector<512x27xbf16>, vector<27x32xbf16>, vector<512x32xf32> -> vector<512x32xf32>
    %c0_4 = arith.constant 0 : index
    %c0_5 = arith.constant 0 : index
    %4 = vector.load %arg3[%c0_4, %c0_5] : memref<1x32xf32, #tpu.memory_space<vmem>>, vector<1x32xf32>
    %5 = vector.broadcast %4 : vector<1x32xf32> to vector<512x32xf32>
    %6 = arith.addf %3, %5 : vector<512x32xf32>
    %cst_6 = arith.constant 0.000000e+00 : f32
    %7 = vector.broadcast %cst_6 : f32 to vector<512x32xf32>
    %8 = arith.maximumf %6, %7 : vector<512x32xf32>
    %c0_7 = arith.constant 0 : index
    %c0_8 = arith.constant 0 : index
    %9 = vector.load %arg1[%c0_7, %c0_8] : memref<8x512xbf16, #tpu.memory_space<vmem>>, vector<8x512xbf16>
    %10 = arith.truncf %8 : vector<512x32xf32> to vector<512x32xbf16>
    %cst_9 = arith.constant dense<0.000000e+00> : vector<8x32xf32>
    %11 = tpu.matmul %9, %10, %cst_9 {dimension_numbers = #tpu.dot_dimension_numbers<[1], [0], [0], [1], [0, 0, 1, 1], [], []>} : vector<8x512xbf16>, vector<512x32xbf16>, vector<8x32xf32> -> vector<8x32xf32>
    %c0_10 = arith.constant 0 : index
    %c0_11 = arith.constant 0 : index
    %12 = vector.load %arg6[%c0_10, %c0_11] : memref<4x32xf32, #tpu.memory_space<vmem>>, vector<4x32xf32>
    %13 = arith.truncf %11 : vector<8x32xf32> to vector<8x32xbf16>
    %c0_12 = arith.constant 0 : index
    %c0_13 = arith.constant 0 : index
    %14 = vector.load %arg4[%c0_12, %c0_13] : memref<32x32xbf16, #tpu.memory_space<vmem>>, vector<32x32xbf16>
    %cst_14 = arith.constant dense<0.000000e+00> : vector<8x32xf32>
    %15 = tpu.matmul %13, %14, %cst_14 {dimension_numbers = #tpu.dot_dimension_numbers<[1], [0], [0], [1], [0, 0, 1, 1], [], []>} : vector<8x32xbf16>, vector<32x32xbf16>, vector<8x32xf32> -> vector<8x32xf32>
    %16 = vector.extract_strided_slice %12 {offsets = [0, 0], sizes = [1, 32], strides = [1, 1]} : vector<4x32xf32> to vector<1x32xf32>
    %17 = vector.broadcast %16 : vector<1x32xf32> to vector<8x32xf32>
    %18 = arith.addf %15, %17 : vector<8x32xf32>
    %cst_15 = arith.constant dense<0.000000e+00> : vector<32xf32>
    %19 = vector.multi_reduction <add>, %18, %cst_15 [0] : vector<8x32xf32> to vector<32xf32>
    %20 = vector.shape_cast %19 : vector<32xf32> to vector<1x32xf32>
    %cst_16 = arith.constant 8.000000e+00 : f32
    %21 = vector.broadcast %cst_16 : f32 to vector<1x32xf32>
    %22 = arith.divf %20, %21 : vector<1x32xf32>
    %23 = vector.broadcast %22 : vector<1x32xf32> to vector<8x32xf32>
    %24 = arith.subf %18, %23 : vector<8x32xf32>
    %25 = arith.mulf %24, %24 : vector<8x32xf32>
    %cst_17 = arith.constant dense<0.000000e+00> : vector<32xf32>
    %26 = vector.multi_reduction <add>, %25, %cst_17 [0] : vector<8x32xf32> to vector<32xf32>
    %27 = vector.shape_cast %26 : vector<32xf32> to vector<1x32xf32>
    %cst_18 = arith.constant 8.000000e+00 : f32
    %28 = vector.broadcast %cst_18 : f32 to vector<1x32xf32>
    %29 = arith.divf %27, %28 : vector<1x32xf32>
    %30 = vector.broadcast %22 : vector<1x32xf32> to vector<8x32xf32>
    %31 = arith.subf %18, %30 : vector<8x32xf32>
    %cst_19 = arith.constant 9.99999974E-6 : f32
    %32 = vector.broadcast %cst_19 : f32 to vector<1x32xf32>
    %33 = arith.addf %29, %32 : vector<1x32xf32>
    %34 = math.rsqrt %33 : vector<1x32xf32>
    %35 = vector.broadcast %34 : vector<1x32xf32> to vector<8x32xf32>
    %36 = arith.mulf %31, %35 : vector<8x32xf32>
    %37 = vector.extract_strided_slice %12 {offsets = [1, 0], sizes = [1, 32], strides = [1, 1]} : vector<4x32xf32> to vector<1x32xf32>
    %38 = vector.broadcast %37 : vector<1x32xf32> to vector<8x32xf32>
    %39 = arith.mulf %36, %38 : vector<8x32xf32>
    %40 = vector.extract_strided_slice %12 {offsets = [2, 0], sizes = [1, 32], strides = [1, 1]} : vector<4x32xf32> to vector<1x32xf32>
    %41 = vector.broadcast %40 : vector<1x32xf32> to vector<8x32xf32>
    %42 = arith.addf %39, %41 : vector<8x32xf32>
    %cst_20 = arith.constant 0.000000e+00 : f32
    %43 = vector.broadcast %cst_20 : f32 to vector<8x32xf32>
    %44 = arith.maximumf %42, %43 : vector<8x32xf32>
    %45 = arith.truncf %44 : vector<8x32xf32> to vector<8x32xbf16>
    %c0_21 = arith.constant 0 : index
    %c0_22 = arith.constant 0 : index
    %46 = vector.load %arg5[%c0_21, %c0_22] : memref<32x16xbf16, #tpu.memory_space<vmem>>, vector<32x16xbf16>
    %cst_23 = arith.constant dense<0.000000e+00> : vector<8x16xf32>
    %47 = tpu.matmul %45, %46, %cst_23 {dimension_numbers = #tpu.dot_dimension_numbers<[1], [0], [0], [1], [0, 0, 1, 1], [], []>} : vector<8x32xbf16>, vector<32x16xbf16>, vector<8x16xf32> -> vector<8x16xf32>
    %48 = vector.extract_strided_slice %12 {offsets = [3, 0], sizes = [1, 16], strides = [1, 1]} : vector<4x32xf32> to vector<1x16xf32>
    %49 = vector.broadcast %48 : vector<1x16xf32> to vector<8x16xf32>
    %50 = arith.addf %47, %49 : vector<8x16xf32>
    %c0_24 = arith.constant 0 : index
    %c0_25 = arith.constant 0 : index
    %51 = vector.load %arg9[%c0_24, %c0_25] : memref<4x32xf32, #tpu.memory_space<vmem>>, vector<4x32xf32>
    %52 = arith.truncf %50 : vector<8x16xf32> to vector<8x16xbf16>
    %c0_26 = arith.constant 0 : index
    %c0_27 = arith.constant 0 : index
    %53 = vector.load %arg7[%c0_26, %c0_27] : memref<16x32xbf16, #tpu.memory_space<vmem>>, vector<16x32xbf16>
    %cst_28 = arith.constant dense<0.000000e+00> : vector<8x32xf32>
    %54 = tpu.matmul %52, %53, %cst_28 {dimension_numbers = #tpu.dot_dimension_numbers<[1], [0], [0], [1], [0, 0, 1, 1], [], []>} : vector<8x16xbf16>, vector<16x32xbf16>, vector<8x32xf32> -> vector<8x32xf32>
    %55 = vector.extract_strided_slice %51 {offsets = [0, 0], sizes = [1, 32], strides = [1, 1]} : vector<4x32xf32> to vector<1x32xf32>
    %56 = vector.broadcast %55 : vector<1x32xf32> to vector<8x32xf32>
    %57 = arith.addf %54, %56 : vector<8x32xf32>
    %cst_29 = arith.constant dense<0.000000e+00> : vector<32xf32>
    %58 = vector.multi_reduction <add>, %57, %cst_29 [0] : vector<8x32xf32> to vector<32xf32>
    %59 = vector.shape_cast %58 : vector<32xf32> to vector<1x32xf32>
    %cst_30 = arith.constant 8.000000e+00 : f32
    %60 = vector.broadcast %cst_30 : f32 to vector<1x32xf32>
    %61 = arith.divf %59, %60 : vector<1x32xf32>
    %62 = vector.broadcast %61 : vector<1x32xf32> to vector<8x32xf32>
    %63 = arith.subf %57, %62 : vector<8x32xf32>
    %64 = arith.mulf %63, %63 : vector<8x32xf32>
    %cst_31 = arith.constant dense<0.000000e+00> : vector<32xf32>
    %65 = vector.multi_reduction <add>, %64, %cst_31 [0] : vector<8x32xf32> to vector<32xf32>
    %66 = vector.shape_cast %65 : vector<32xf32> to vector<1x32xf32>
    %cst_32 = arith.constant 8.000000e+00 : f32
    %67 = vector.broadcast %cst_32 : f32 to vector<1x32xf32>
    %68 = arith.divf %66, %67 : vector<1x32xf32>
    %69 = vector.broadcast %61 : vector<1x32xf32> to vector<8x32xf32>
    %70 = arith.subf %57, %69 : vector<8x32xf32>
    %cst_33 = arith.constant 9.99999974E-6 : f32
    %71 = vector.broadcast %cst_33 : f32 to vector<1x32xf32>
    %72 = arith.addf %68, %71 : vector<1x32xf32>
    %73 = math.rsqrt %72 : vector<1x32xf32>
    %74 = vector.broadcast %73 : vector<1x32xf32> to vector<8x32xf32>
    %75 = arith.mulf %70, %74 : vector<8x32xf32>
    %76 = vector.extract_strided_slice %51 {offsets = [1, 0], sizes = [1, 32], strides = [1, 1]} : vector<4x32xf32> to vector<1x32xf32>
    %77 = vector.broadcast %76 : vector<1x32xf32> to vector<8x32xf32>
    %78 = arith.mulf %75, %77 : vector<8x32xf32>
    %79 = vector.extract_strided_slice %51 {offsets = [2, 0], sizes = [1, 32], strides = [1, 1]} : vector<4x32xf32> to vector<1x32xf32>
    %80 = vector.broadcast %79 : vector<1x32xf32> to vector<8x32xf32>
    %81 = arith.addf %78, %80 : vector<8x32xf32>
    %cst_34 = arith.constant 0.000000e+00 : f32
    %82 = vector.broadcast %cst_34 : f32 to vector<8x32xf32>
    %83 = arith.maximumf %81, %82 : vector<8x32xf32>
    %84 = arith.truncf %83 : vector<8x32xf32> to vector<8x32xbf16>
    %c0_35 = arith.constant 0 : index
    %c0_36 = arith.constant 0 : index
    %85 = vector.load %arg8[%c0_35, %c0_36] : memref<32x16xbf16, #tpu.memory_space<vmem>>, vector<32x16xbf16>
    %cst_37 = arith.constant dense<0.000000e+00> : vector<8x16xf32>
    %86 = tpu.matmul %84, %85, %cst_37 {dimension_numbers = #tpu.dot_dimension_numbers<[1], [0], [0], [1], [0, 0, 1, 1], [], []>} : vector<8x32xbf16>, vector<32x16xbf16>, vector<8x16xf32> -> vector<8x16xf32>
    %87 = vector.extract_strided_slice %51 {offsets = [3, 0], sizes = [1, 16], strides = [1, 1]} : vector<4x32xf32> to vector<1x16xf32>
    %88 = vector.broadcast %87 : vector<1x16xf32> to vector<8x16xf32>
    %89 = arith.addf %86, %88 : vector<8x16xf32>
    %c1 = arith.constant 1 : index
    %c0_38 = arith.constant 0 : index
    %c0_39 = arith.constant 0 : index
    %90 = vector.load %arg0[%c1, %c0_38, %c0_39] : memref<2x512x27xbf16, #tpu.memory_space<vmem>>, vector<1x512x27xbf16>
    %91 = vector.shape_cast %90 : vector<1x512x27xbf16> to vector<512x27xbf16>
    %c0_40 = arith.constant 0 : index
    %c0_41 = arith.constant 0 : index
    %92 = vector.load %arg2[%c0_40, %c0_41] : memref<27x32xbf16, #tpu.memory_space<vmem>>, vector<27x32xbf16>
    %cst_42 = arith.constant dense<0.000000e+00> : vector<512x32xf32>
    %93 = tpu.matmul %91, %92, %cst_42 {dimension_numbers = #tpu.dot_dimension_numbers<[1], [0], [0], [1], [0, 0, 1, 1], [], []>} : vector<512x27xbf16>, vector<27x32xbf16>, vector<512x32xf32> -> vector<512x32xf32>
    %c0_43 = arith.constant 0 : index
    %c0_44 = arith.constant 0 : index
    %94 = vector.load %arg3[%c0_43, %c0_44] : memref<1x32xf32, #tpu.memory_space<vmem>>, vector<1x32xf32>
    %95 = vector.broadcast %94 : vector<1x32xf32> to vector<512x32xf32>
    %96 = arith.addf %93, %95 : vector<512x32xf32>
    %cst_45 = arith.constant 0.000000e+00 : f32
    %97 = vector.broadcast %cst_45 : f32 to vector<512x32xf32>
    %98 = arith.maximumf %96, %97 : vector<512x32xf32>
    %c0_46 = arith.constant 0 : index
    %c0_47 = arith.constant 0 : index
    %99 = vector.load %arg1[%c0_46, %c0_47] : memref<8x512xbf16, #tpu.memory_space<vmem>>, vector<8x512xbf16>
    %100 = arith.truncf %98 : vector<512x32xf32> to vector<512x32xbf16>
    %cst_48 = arith.constant dense<0.000000e+00> : vector<8x32xf32>
    %101 = tpu.matmul %99, %100, %cst_48 {dimension_numbers = #tpu.dot_dimension_numbers<[1], [0], [0], [1], [0, 0, 1, 1], [], []>} : vector<8x512xbf16>, vector<512x32xbf16>, vector<8x32xf32> -> vector<8x32xf32>
    %c0_49 = arith.constant 0 : index
    %c0_50 = arith.constant 0 : index
    %102 = vector.load %arg6[%c0_49, %c0_50] : memref<4x32xf32, #tpu.memory_space<vmem>>, vector<4x32xf32>
    %103 = arith.truncf %101 : vector<8x32xf32> to vector<8x32xbf16>
    %c0_51 = arith.constant 0 : index
    %c0_52 = arith.constant 0 : index
    %104 = vector.load %arg4[%c0_51, %c0_52] : memref<32x32xbf16, #tpu.memory_space<vmem>>, vector<32x32xbf16>
    %cst_53 = arith.constant dense<0.000000e+00> : vector<8x32xf32>
    %105 = tpu.matmul %103, %104, %cst_53 {dimension_numbers = #tpu.dot_dimension_numbers<[1], [0], [0], [1], [0, 0, 1, 1], [], []>} : vector<8x32xbf16>, vector<32x32xbf16>, vector<8x32xf32> -> vector<8x32xf32>
    %106 = vector.extract_strided_slice %102 {offsets = [0, 0], sizes = [1, 32], strides = [1, 1]} : vector<4x32xf32> to vector<1x32xf32>
    %107 = vector.broadcast %106 : vector<1x32xf32> to vector<8x32xf32>
    %108 = arith.addf %105, %107 : vector<8x32xf32>
    %cst_54 = arith.constant dense<0.000000e+00> : vector<32xf32>
    %109 = vector.multi_reduction <add>, %108, %cst_54 [0] : vector<8x32xf32> to vector<32xf32>
    %110 = vector.shape_cast %109 : vector<32xf32> to vector<1x32xf32>
    %cst_55 = arith.constant 8.000000e+00 : f32
    %111 = vector.broadcast %cst_55 : f32 to vector<1x32xf32>
    %112 = arith.divf %110, %111 : vector<1x32xf32>
    %113 = vector.broadcast %112 : vector<1x32xf32> to vector<8x32xf32>
    %114 = arith.subf %108, %113 : vector<8x32xf32>
    %115 = arith.mulf %114, %114 : vector<8x32xf32>
    %cst_56 = arith.constant dense<0.000000e+00> : vector<32xf32>
    %116 = vector.multi_reduction <add>, %115, %cst_56 [0] : vector<8x32xf32> to vector<32xf32>
    %117 = vector.shape_cast %116 : vector<32xf32> to vector<1x32xf32>
    %cst_57 = arith.constant 8.000000e+00 : f32
    %118 = vector.broadcast %cst_57 : f32 to vector<1x32xf32>
    %119 = arith.divf %117, %118 : vector<1x32xf32>
    %120 = vector.broadcast %112 : vector<1x32xf32> to vector<8x32xf32>
    %121 = arith.subf %108, %120 : vector<8x32xf32>
    %cst_58 = arith.constant 9.99999974E-6 : f32
    %122 = vector.broadcast %cst_58 : f32 to vector<1x32xf32>
    %123 = arith.addf %119, %122 : vector<1x32xf32>
    %124 = math.rsqrt %123 : vector<1x32xf32>
    %125 = vector.broadcast %124 : vector<1x32xf32> to vector<8x32xf32>
    %126 = arith.mulf %121, %125 : vector<8x32xf32>
    %127 = vector.extract_strided_slice %102 {offsets = [1, 0], sizes = [1, 32], strides = [1, 1]} : vector<4x32xf32> to vector<1x32xf32>
    %128 = vector.broadcast %127 : vector<1x32xf32> to vector<8x32xf32>
    %129 = arith.mulf %126, %128 : vector<8x32xf32>
    %130 = vector.extract_strided_slice %102 {offsets = [2, 0], sizes = [1, 32], strides = [1, 1]} : vector<4x32xf32> to vector<1x32xf32>
    %131 = vector.broadcast %130 : vector<1x32xf32> to vector<8x32xf32>
    %132 = arith.addf %129, %131 : vector<8x32xf32>
    %cst_59 = arith.constant 0.000000e+00 : f32
    %133 = vector.broadcast %cst_59 : f32 to vector<8x32xf32>
    %134 = arith.maximumf %132, %133 : vector<8x32xf32>
    %135 = arith.truncf %134 : vector<8x32xf32> to vector<8x32xbf16>
    %c0_60 = arith.constant 0 : index
    %c0_61 = arith.constant 0 : index
    %136 = vector.load %arg5[%c0_60, %c0_61] : memref<32x16xbf16, #tpu.memory_space<vmem>>, vector<32x16xbf16>
    %cst_62 = arith.constant dense<0.000000e+00> : vector<8x16xf32>
    %137 = tpu.matmul %135, %136, %cst_62 {dimension_numbers = #tpu.dot_dimension_numbers<[1], [0], [0], [1], [0, 0, 1, 1], [], []>} : vector<8x32xbf16>, vector<32x16xbf16>, vector<8x16xf32> -> vector<8x16xf32>
    %138 = vector.extract_strided_slice %102 {offsets = [3, 0], sizes = [1, 16], strides = [1, 1]} : vector<4x32xf32> to vector<1x16xf32>
    %139 = vector.broadcast %138 : vector<1x16xf32> to vector<8x16xf32>
    %140 = arith.addf %137, %139 : vector<8x16xf32>
    %c0_63 = arith.constant 0 : index
    %c0_64 = arith.constant 0 : index
    %141 = vector.load %arg9[%c0_63, %c0_64] : memref<4x32xf32, #tpu.memory_space<vmem>>, vector<4x32xf32>
    %142 = arith.truncf %140 : vector<8x16xf32> to vector<8x16xbf16>
    %c0_65 = arith.constant 0 : index
    %c0_66 = arith.constant 0 : index
    %143 = vector.load %arg7[%c0_65, %c0_66] : memref<16x32xbf16, #tpu.memory_space<vmem>>, vector<16x32xbf16>
    %cst_67 = arith.constant dense<0.000000e+00> : vector<8x32xf32>
    %144 = tpu.matmul %142, %143, %cst_67 {dimension_numbers = #tpu.dot_dimension_numbers<[1], [0], [0], [1], [0, 0, 1, 1], [], []>} : vector<8x16xbf16>, vector<16x32xbf16>, vector<8x32xf32> -> vector<8x32xf32>
    %145 = vector.extract_strided_slice %141 {offsets = [0, 0], sizes = [1, 32], strides = [1, 1]} : vector<4x32xf32> to vector<1x32xf32>
    %146 = vector.broadcast %145 : vector<1x32xf32> to vector<8x32xf32>
    %147 = arith.addf %144, %146 : vector<8x32xf32>
    %cst_68 = arith.constant dense<0.000000e+00> : vector<32xf32>
    %148 = vector.multi_reduction <add>, %147, %cst_68 [0] : vector<8x32xf32> to vector<32xf32>
    %149 = vector.shape_cast %148 : vector<32xf32> to vector<1x32xf32>
    %cst_69 = arith.constant 8.000000e+00 : f32
    %150 = vector.broadcast %cst_69 : f32 to vector<1x32xf32>
    %151 = arith.divf %149, %150 : vector<1x32xf32>
    %152 = vector.broadcast %151 : vector<1x32xf32> to vector<8x32xf32>
    %153 = arith.subf %147, %152 : vector<8x32xf32>
    %154 = arith.mulf %153, %153 : vector<8x32xf32>
    %cst_70 = arith.constant dense<0.000000e+00> : vector<32xf32>
    %155 = vector.multi_reduction <add>, %154, %cst_70 [0] : vector<8x32xf32> to vector<32xf32>
    %156 = vector.shape_cast %155 : vector<32xf32> to vector<1x32xf32>
    %cst_71 = arith.constant 8.000000e+00 : f32
    %157 = vector.broadcast %cst_71 : f32 to vector<1x32xf32>
    %158 = arith.divf %156, %157 : vector<1x32xf32>
    %159 = vector.broadcast %151 : vector<1x32xf32> to vector<8x32xf32>
    %160 = arith.subf %147, %159 : vector<8x32xf32>
    %cst_72 = arith.constant 9.99999974E-6 : f32
    %161 = vector.broadcast %cst_72 : f32 to vector<1x32xf32>
    %162 = arith.addf %158, %161 : vector<1x32xf32>
    %163 = math.rsqrt %162 : vector<1x32xf32>
    %164 = vector.broadcast %163 : vector<1x32xf32> to vector<8x32xf32>
    %165 = arith.mulf %160, %164 : vector<8x32xf32>
    %166 = vector.extract_strided_slice %141 {offsets = [1, 0], sizes = [1, 32], strides = [1, 1]} : vector<4x32xf32> to vector<1x32xf32>
    %167 = vector.broadcast %166 : vector<1x32xf32> to vector<8x32xf32>
    %168 = arith.mulf %165, %167 : vector<8x32xf32>
    %169 = vector.extract_strided_slice %141 {offsets = [2, 0], sizes = [1, 32], strides = [1, 1]} : vector<4x32xf32> to vector<1x32xf32>
    %170 = vector.broadcast %169 : vector<1x32xf32> to vector<8x32xf32>
    %171 = arith.addf %168, %170 : vector<8x32xf32>
    %cst_73 = arith.constant 0.000000e+00 : f32
    %172 = vector.broadcast %cst_73 : f32 to vector<8x32xf32>
    %173 = arith.maximumf %171, %172 : vector<8x32xf32>
    %174 = arith.truncf %173 : vector<8x32xf32> to vector<8x32xbf16>
    %c0_74 = arith.constant 0 : index
    %c0_75 = arith.constant 0 : index
    %175 = vector.load %arg8[%c0_74, %c0_75] : memref<32x16xbf16, #tpu.memory_space<vmem>>, vector<32x16xbf16>
    %cst_76 = arith.constant dense<0.000000e+00> : vector<8x16xf32>
    %176 = tpu.matmul %174, %175, %cst_76 {dimension_numbers = #tpu.dot_dimension_numbers<[1], [0], [0], [1], [0, 0, 1, 1], [], []>} : vector<8x32xbf16>, vector<32x16xbf16>, vector<8x16xf32> -> vector<8x16xf32>
    %177 = vector.extract_strided_slice %141 {offsets = [3, 0], sizes = [1, 16], strides = [1, 1]} : vector<4x32xf32> to vector<1x16xf32>
    %178 = vector.broadcast %177 : vector<1x16xf32> to vector<8x16xf32>
    %179 = arith.addf %176, %178 : vector<8x16xf32>
    %180 = arith.mulf %89, %89 : vector<8x16xf32>
    %cst_77 = arith.constant dense<0.000000e+00> : vector<8xf32>
    %181 = vector.multi_reduction <add>, %180, %cst_77 [1] : vector<8x16xf32> to vector<8xf32>
    %182 = vector.shape_cast %181 : vector<8xf32> to vector<8x1xf32>
    %cst_78 = arith.constant 1.000000e-24 : f32
    %183 = vector.broadcast %cst_78 : f32 to vector<8x1xf32>
    %184 = arith.maximumf %182, %183 : vector<8x1xf32>
    %185 = math.rsqrt %184 : vector<8x1xf32>
    %186 = vector.broadcast %185 : vector<8x1xf32> to vector<8x16xf32>
    %187 = arith.mulf %89, %186 : vector<8x16xf32>
    %188 = arith.mulf %179, %179 : vector<8x16xf32>
    %cst_79 = arith.constant dense<0.000000e+00> : vector<8xf32>
    %189 = vector.multi_reduction <add>, %188, %cst_79 [1] : vector<8x16xf32> to vector<8xf32>
    %190 = vector.shape_cast %189 : vector<8xf32> to vector<8x1xf32>
    %cst_80 = arith.constant 1.000000e-24 : f32
    %191 = vector.broadcast %cst_80 : f32 to vector<8x1xf32>
    %192 = arith.maximumf %190, %191 : vector<8x1xf32>
    %193 = math.rsqrt %192 : vector<8x1xf32>
    %194 = vector.broadcast %193 : vector<8x1xf32> to vector<8x16xf32>
    %195 = arith.mulf %179, %194 : vector<8x16xf32>
    %196 = arith.mulf %50, %50 : vector<8x16xf32>
    %cst_81 = arith.constant dense<0.000000e+00> : vector<8xf32>
    %197 = vector.multi_reduction <add>, %196, %cst_81 [1] : vector<8x16xf32> to vector<8xf32>
    %198 = vector.shape_cast %197 : vector<8xf32> to vector<8x1xf32>
    %cst_82 = arith.constant 1.000000e-24 : f32
    %199 = vector.broadcast %cst_82 : f32 to vector<8x1xf32>
    %200 = arith.maximumf %198, %199 : vector<8x1xf32>
    %201 = math.rsqrt %200 : vector<8x1xf32>
    %202 = vector.broadcast %201 : vector<8x1xf32> to vector<8x16xf32>
    %203 = arith.mulf %50, %202 : vector<8x16xf32>
    %204 = arith.mulf %140, %140 : vector<8x16xf32>
    %cst_83 = arith.constant dense<0.000000e+00> : vector<8xf32>
    %205 = vector.multi_reduction <add>, %204, %cst_83 [1] : vector<8x16xf32> to vector<8xf32>
    %206 = vector.shape_cast %205 : vector<8xf32> to vector<8x1xf32>
    %cst_84 = arith.constant 1.000000e-24 : f32
    %207 = vector.broadcast %cst_84 : f32 to vector<8x1xf32>
    %208 = arith.maximumf %206, %207 : vector<8x1xf32>
    %209 = math.rsqrt %208 : vector<8x1xf32>
    %210 = vector.broadcast %209 : vector<8x1xf32> to vector<8x16xf32>
    %211 = arith.mulf %140, %210 : vector<8x16xf32>
    %212 = arith.mulf %187, %211 : vector<8x16xf32>
    %cst_85 = arith.constant dense<0.000000e+00> : vector<8xf32>
    %213 = vector.multi_reduction <add>, %212, %cst_85 [1] : vector<8x16xf32> to vector<8xf32>
    %214 = vector.shape_cast %213 : vector<8xf32> to vector<8x1xf32>
    %cst_86 = arith.constant 2.000000e+00 : f32
    %215 = vector.broadcast %cst_86 : f32 to vector<8x1xf32>
    %216 = arith.mulf %215, %214 : vector<8x1xf32>
    %cst_87 = arith.constant 2.000000e+00 : f32
    %217 = vector.broadcast %cst_87 : f32 to vector<8x1xf32>
    %218 = arith.subf %217, %216 : vector<8x1xf32>
    %219 = arith.mulf %195, %203 : vector<8x16xf32>
    %cst_88 = arith.constant dense<0.000000e+00> : vector<8xf32>
    %220 = vector.multi_reduction <add>, %219, %cst_88 [1] : vector<8x16xf32> to vector<8xf32>
    %221 = vector.shape_cast %220 : vector<8xf32> to vector<8x1xf32>
    %cst_89 = arith.constant 2.000000e+00 : f32
    %222 = vector.broadcast %cst_89 : f32 to vector<8x1xf32>
    %223 = arith.mulf %222, %221 : vector<8x1xf32>
    %cst_90 = arith.constant 2.000000e+00 : f32
    %224 = vector.broadcast %cst_90 : f32 to vector<8x1xf32>
    %225 = arith.subf %224, %223 : vector<8x1xf32>
    %226 = arith.addf %218, %225 : vector<8x1xf32>
    %c0_91 = arith.constant 0 : index
    %c0_92 = arith.constant 0 : index
    %227 = vector.load %arg10[%c0_91, %c0_92] : memref<8x1xf32, #tpu.memory_space<vmem>>, vector<8x1xf32>
    tpu.vector_store %arg10[%c0_91, %c0_92], %226 {strides = array<i32>} : memref<8x1xf32, #tpu.memory_space<vmem>>, vector<8x1xf32>,
    return
  }
}

</mosaic_0001>

<bundles_post_ra>
// kernel: meta_byol_forward.1
= control target key start
LH: loop header
LB: loop body
LE: loop exit
PB: predicated region body
PF: predicated region fallthrough
CT: control target
= control target key end

     0   :  { %vm379_vm0 = vcmask 1044480   ;;  %vm380_vm1 = vcmask 1045504   ;;  %vm282_vm2 = vcmask 220160   ;;  %v2927_v1 = vmov 65535   ;;  %s3702_s2 = inlined_call_operand.vmem [shape: bf16[27,32], index: 2, kind: input, shape index: {}]   ;;  %s3703_s0 = inlined_call_operand.vmem [shape: bf16[2,512,27], index: 0, kind: input, shape index: {}]   ;;  %s3704_s1 = inlined_call_operand.vmem [shape: bf16[8,512], index: 1, kind: input, shape index: {}]   ;;  %s3705_s3 = inlined_call_operand.vmem [shape: f32[1,32], index: 3, kind: input, shape index: {}]   ;;  %s3706_s4 = inlined_call_operand.vmem [shape: bf16[32,32], index: 4, kind: input, shape index: {}]   ;;  %s3707_s5 = inlined_call_operand.vmem [shape: bf16[32,16], index: 5, kind: input, shape index: {}]   ;;  %s3708_s6 = inlined_call_operand.vmem [shape: f32[4,32], index: 6, kind: input, shape index: {}]   ;;  %s3709_s7 = inlined_call_operand.vmem [shape: bf16[16,32], index: 7, kind: input, shape index: {}]   ;;  %s3710_s8 = inlined_call_operand.vmem [shape: bf16[32,16], index: 8, kind: input, shape index: {}]   ;;  %s3711_s9 = inlined_call_operand.vmem [shape: f32[4,32], index: 9, kind: input, shape index: {}]   ;;  %s3712_s10 = inlined_call_operand.vmem [shape: f32[8,1], index: 10, kind: output, shape index: {}]  }
   0x1   :  { %v2832_v0 = vld [vmem:[%s3702_s2] sm:$0xff]   ;;  %v381_v2 = vsel %vm379_vm0, 4294967295, %v2927_v1  ;;  %v2833_v3 = vld [vmem:[%s3702_s2 + $0x8] sm:$0x3f]   ;;  %v2836_v8 = vld [vmem:[%s3703_s0 + $0x10] sm:$0xff]   ;;  %vm2929_vm3 = vmmov 0  }
   0x2   :  { %2633 = vmatprep.subr.bf16.mxu0 %v2832_v0  ;;  %v382_v4 = vsel %vm380_vm1, %v381_v2, 0  ;;  %v2834_v5 = vld [vmem:[%s3703_s0] sm:$0xff]   ;;  %v2835_v7 = vld [vmem:[%s3703_s0 + $0x8] sm:$0xff]   ;;  %v2837_v9 = vld [vmem:[%s3703_s0 + $0x18] sm:$0xff]   ;;  %vm889_vm4 = vcmask 261120   ;;  %vm1044_vm5 = vcmask 130048  }
   0x3   :  { %2634 = vmatpush3.bf16.msra.mxu0 %v2832_v0  ;;  %v2994_v6 = vand.u32 %v2833_v3, %v382_v4  ;;  %2637 = vmatprep.mubr.msk.bf16.mxu0 %vm282_vm2, %v2834_v5  ;;  %v2838_v10 = vld [vmem:[%s3703_s0 + $0x20] sm:$0xff]   ;;  %v2839_v11 = vld [vmem:[%s3703_s0 + $0x28] sm:$0xff]   ;;  %v2840_v12 = vld [vmem:[%s3703_s0 + $0x30] sm:$0xff]   ;;  %vm2235_vm6 = vcmask 7168  }
   0x4   :  { %v2841_v13 = vld [vmem:[%s3703_s0 + $0x38] sm:$0xff]   ;;  %v2842_v14 = vld [vmem:[%s3703_s0 + $0x40] sm:$0xff]   ;;  %v2843_v15 = vld [vmem:[%s3703_s0 + $0x48] sm:$0xff]  }
   0x5   :  { %2635 = vmatprep.subr.bf16.mxu0 %v2994_v6  ;;  %v2844_v16 = vld [vmem:[%s3703_s0 + $0x50] sm:$0xff]   ;;  %v2845_v17 = vld [vmem:[%s3703_s0 + $0x58] sm:$0xff]   ;;  %v2846_v18 = vld [vmem:[%s3703_s0 + $0x60] sm:$0xff]  }
   0x6   :  { %v2847_v19 = vld [vmem:[%s3703_s0 + $0x68] sm:$0xff]   ;;  %v2848_v20 = vld [vmem:[%s3703_s0 + $0x70] sm:$0xff]   ;;  %v2849_v21 = vld [vmem:[%s3703_s0 + $0x78] sm:$0xff]  }
   0x7   :  { %2636 = vmatpush3.bf16.msra.mxu0 %v2994_v6  ;;  %v2850_v22 = vld [vmem:[%s3703_s0 + $0x80] sm:$0xff]   ;;  %v2851_v23 = vld [vmem:[%s3703_s0 + $0x88] sm:$0xff]   ;;  %v2852_v24 = vld [vmem:[%s3703_s0 + $0x90] sm:$0xff]  }
   0x8   :  { %v2853_v25 = vld [vmem:[%s3703_s0 + $0x98] sm:$0xff]   ;;  %v2854_v26 = vld [vmem:[%s3703_s0 + $0xa0] sm:$0xff]   ;;  %v2855_v27 = vld [vmem:[%s3703_s0 + $0xa8] sm:$0xff]  }
   0x9   :  { %v2856_v28 = vld [vmem:[%s3703_s0 + $0xb0] sm:$0xff]   ;;  %v2857_v29 = vld [vmem:[%s3703_s0 + $0xb8] sm:$0xff]   ;;  %v2858_v30 = vld [vmem:[%s3703_s0 + $0xc0] sm:$0xff]  }
   0xa   :  { %2638 = vmatmul.mubr.msk.bf16.vlgmr.msra.gmra.mrb[0].mxu0 %vm282_vm2, %v2835_v7  ;;  %v2859_v31 = vld [vmem:[%s3703_s0 + $0xc8] sm:$0xff]   ;;  %v2860_v32 = vld [vmem:[%s3703_s0 + $0xd0] sm:$0xff]   ;;  %v2861_v33 = vld [vmem:[%s3703_s0 + $0xd8] sm:$0xff]  }
   0xb   :  { %2641 = vmatprep.mubr.msk.bf16.mxu0 %vm282_vm2, %v2836_v8  ;;  %v2862_v34 = vld [vmem:[%s3703_s0 + $0xe0] sm:$0xff]   ;;  %v2863_v35 = vld [vmem:[%s3703_s0 + $0xe8] sm:$0xff]   ;;  %v2864_v36 = vld [vmem:[%s3703_s0 + $0xf0] sm:$0xff]  }
   0xc   :  { %v2865_v37 = vld [vmem:[%s3703_s0 + $0xf8] sm:$0xff]   ;;  %v3126_v38 = vld [vmem:[%s3704_s1] sm:$0xff] }
   0xd   :  { %v2309_v39 = vcombine.high %v3126_v38, %v3126_v38  ;;  %v3133_v40 = vld [vmem:[%s3705_s3] ss:$0 sm:$0xff] }
   0xf   :  { %819 = vmatprep.mubr.bf16.mxu1 %v2309_v39 }
  0x12   :  { %2642 = vmatmul.mubr.msk.bf16.gmra.mrb[4].mxu0 %vm282_vm2, %v2837_v9 }
  0x13   :  { %2645 = vmatprep.mubr.msk.bf16.mxu0 %vm282_vm2, %v2838_v10 }
  0x1a   :  { %2646 = vmatmul.mubr.msk.bf16.gmra.mrb[8].mxu0 %vm282_vm2, %v2839_v11 }
  0x1b   :  { %2649 = vmatprep.mubr.msk.bf16.mxu0 %vm282_vm2, %v2840_v12 }
  0x22   :  { %2650 = vmatmul.mubr.msk.bf16.gmra.mrb[12].mxu0 %vm282_vm2, %v2841_v13 }
  0x23   :  { %2653 = vmatprep.mubr.msk.bf16.mxu0 %vm282_vm2, %v2842_v14 }
  0x2a   :  { %2654 = vmatmul.mubr.msk.bf16.gmra.mrb[16].mxu0 %vm282_vm2, %v2843_v15 }
  0x2b   :  { %2657 = vmatprep.mubr.msk.bf16.mxu0 %vm282_vm2, %v2844_v16 }
  0x32   :  { %2658 = vmatmul.mubr.msk.bf16.gmra.mrb[20].mxu0 %vm282_vm2, %v2845_v17 }
  0x33   :  { %2661 = vmatprep.mubr.msk.bf16.mxu0 %vm282_vm2, %v2846_v18 }
  0x3a   :  { %2662 = vmatmul.mubr.msk.bf16.gmra.mrb[24].mxu0 %vm282_vm2, %v2847_v19 }
  0x3b   :  { %2665 = vmatprep.mubr.msk.bf16.mxu0 %vm282_vm2, %v2848_v20 }
  0x42   :  { %2666 = vmatmul.mubr.msk.bf16.gmra.mrb[28].mxu0 %vm282_vm2, %v2849_v21 }
  0x43   :  { %2669 = vmatprep.mubr.msk.bf16.mxu0 %vm282_vm2, %v2850_v22 }
  0x4a   :  { %2670 = vmatmul.mubr.msk.bf16.gmra.mrb[32].mxu0 %vm282_vm2, %v2851_v23 }
  0x4b   :  { %2673 = vmatprep.mubr.msk.bf16.mxu0 %vm282_vm2, %v2852_v24 }
  0x52   :  { %2674 = vmatmul.mubr.msk.bf16.gmra.mrb[36].mxu0 %vm282_vm2, %v2853_v25 }
  0x53   :  { %2677 = vmatprep.mubr.msk.bf16.mxu0 %vm282_vm2, %v2854_v26 }
  0x5a   :  { %2678 = vmatmul.mubr.msk.bf16.gmra.mrb[40].mxu0 %vm282_vm2, %v2855_v27 }
  0x5b   :  { %2681 = vmatprep.mubr.msk.bf16.mxu0 %vm282_vm2, %v2856_v28 }
  0x62   :  { %2682 = vmatmul.mubr.msk.bf16.gmra.mrb[44].mxu0 %vm282_vm2, %v2857_v29 }
  0x63   :  { %2685 = vmatprep.mubr.msk.bf16.mxu0 %vm282_vm2, %v2858_v30 }
  0x6a   :  { %2686 = vmatmul.mubr.msk.bf16.gmra.mrb[48].mxu0 %vm282_vm2, %v2859_v31 }
  0x6b   :  { %2689 = vmatprep.mubr.msk.bf16.mxu0 %vm282_vm2, %v2860_v32 }
  0x72   :  { %2690 = vmatmul.mubr.msk.bf16.gmra.mrb[52].mxu0 %vm282_vm2, %v2861_v33 }
  0x73   :  { %2693 = vmatprep.mubr.msk.bf16.mxu0 %vm282_vm2, %v2862_v34 }
  0x7a   :  { %2694 = vmatmul.mubr.msk.bf16.gmra.mrb[56].mxu0 %vm282_vm2, %v2863_v35 }
  0x7b   :  { %2697 = vmatprep.mubr.msk.bf16.mxu0 %vm282_vm2, %v2864_v36 }
  0x82   :  { %2698 = vmatmul.mubr.msk.bf16.gmra.mrb[60].mxu0 %vm282_vm2, %v2865_v37 }
  0x83   :  { %1922 = vmatprep.mubr.bf16.mxu0 %v2309_v39 }
  0xdd   :  { %v2639_v41 = vpop.f32.mrb[0].mxu0 }
  0xde   :  { %v429_v42 = vadd.f32 %v2639_v41, %v3133_v40  ;;  %v420_v43 = vpop.f32.mrb[1].mxu0 }
  0xdf   :  { %v421_v44 = vadd.f32 %v3133_v40, %v420_v43  ;;  %v2640_v45 = vpop.f32.mrb[2].mxu0 }
  0xe0   :  { %v432_v46 = vadd.f32 %v2640_v45, %v3133_v40  ;;  %v423_v47 = vpop.f32.mrb[3].mxu0  ;;  %v677_v49 = vmax.f32 %v429_v42, 0.0 }
  0xe1   :  { %v424_v48 = vadd.f32 %v3133_v40, %v423_v47  ;;  %v675_v51 = vmax.f32 %v421_v44, 0.0 }
  0xe2   :  { %v678_v50 = vmax.f32 %v432_v46, 0.0 }
  0xe3   :  { %v676_v52 = vmax.f32 %v424_v48, 0.0 }
  0xe4   :  { %v3139_v53 = vpack.c.bf16 %v678_v50, %v677_v49 }
  0xe5   :  { %v2643_v54 = vpop.f32.mrb[4].mxu0  ;;  %v3141_v55 = vpack.c.bf16 %v676_v52, %v675_v51 }
  0xe6   :  { %v445_v56 = vadd.f32 %v2643_v54, %v3133_v40  ;;  %v436_v57 = vpop.f32.mrb[5].mxu0 }
  0xe7   :  { %v437_v58 = vadd.f32 %v3133_v40, %v436_v57  ;;  %v2644_v59 = vpop.f32.mrb[6].mxu0 }
  0xe8   :  { %v448_v60 = vadd.f32 %v2644_v59, %v3133_v40  ;;  %v439_v61 = vpop.f32.mrb[7].mxu0  ;;  %v681_v63 = vmax.f32 %v445_v56, 0.0 }
  0xe9   :  { %v440_v62 = vadd.f32 %v3133_v40, %v439_v61  ;;  %v679_v1 = vmax.f32 %v437_v58, 0.0 }
  0xea   :  { %v682_v0 = vmax.f32 %v448_v60, 0.0 }
  0xeb   :  { %v680_v2 = vmax.f32 %v440_v62, 0.0 }
  0xec   :  { %v3147_v3 = vpack.c.bf16 %v682_v0, %v681_v63 }
  0xed   :  { %v3149_v4 = vpack.c.bf16 %v680_v2, %v679_v1  ;;  %v2647_v5 = vpop.f32.mrb[8].mxu0 }
  0xee   :  { %v461_v7 = vadd.f32 %v2647_v5, %v3133_v40  ;;  %v452_v8 = vpop.f32.mrb[9].mxu0 }
  0xef   :  { %v453_v9 = vadd.f32 %v3133_v40, %v452_v8  ;;  %v2648_v10 = vpop.f32.mrb[10].mxu0 }
  0xf0   :  { %v464_v11 = vadd.f32 %v2648_v10, %v3133_v40  ;;  %v455_v12 = vpop.f32.mrb[11].mxu0  ;;  %v685_v14 = vmax.f32 %v461_v7, 0.0 }
  0xf1   :  { %v456_v13 = vadd.f32 %v3133_v40, %v455_v12  ;;  %v683_v16 = vmax.f32 %v453_v9, 0.0 }
  0xf2   :  { %v686_v15 = vmax.f32 %v464_v11, 0.0 }
  0xf3   :  { %v684_v17 = vmax.f32 %v456_v13, 0.0 }
  0xf4   :  { %v3155_v18 = vpack.c.bf16 %v686_v15, %v685_v14 }
  0xf5   :  { %v3157_v19 = vpack.c.bf16 %v684_v17, %v683_v16  ;;  %v2651_v20 = vpop.f32.mrb[12].mxu0 }
  0xf6   :  { %v477_v21 = vadd.f32 %v2651_v20, %v3133_v40  ;;  %v468_v22 = vpop.f32.mrb[13].mxu0 }
  0xf7   :  { %v469_v23 = vadd.f32 %v3133_v40, %v468_v22  ;;  %v2652_v24 = vpop.f32.mrb[14].mxu0 }
  0xf8   :  { %v480_v25 = vadd.f32 %v2652_v24, %v3133_v40  ;;  %v471_v26 = vpop.f32.mrb[15].mxu0  ;;  %v689_v28 = vmax.f32 %v477_v21, 0.0 }
  0xf9   :  { %v472_v27 = vadd.f32 %v3133_v40, %v471_v26  ;;  %v687_v30 = vmax.f32 %v469_v23, 0.0 }
  0xfa   :  { %v690_v29 = vmax.f32 %v480_v25, 0.0 }
  0xfb   :  { %v688_v31 = vmax.f32 %v472_v27, 0.0 }
  0xfc   :  { %v3163_v32 = vpack.c.bf16 %v690_v29, %v689_v28 }
  0xfd   :  { %v3165_v33 = vpack.c.bf16 %v688_v31, %v687_v30  ;;  %v2655_v34 = vpop.f32.mrb[16].mxu0 }
  0xfe   :  { %v493_v35 = vadd.f32 %v2655_v34, %v3133_v40  ;;  %v484_v36 = vpop.f32.mrb[17].mxu0 }
  0xff   :  { %v485_v37 = vadd.f32 %v3133_v40, %v484_v36  ;;  %v2656_v39 = vpop.f32.mrb[18].mxu0 }
 0x100   :  { %v496_v41 = vadd.f32 %v2656_v39, %v3133_v40  ;;  %v487_v42 = vpop.f32.mrb[19].mxu0  ;;  %v693_v44 = vmax.f32 %v493_v35, 0.0 }
 0x101   :  { %v488_v43 = vadd.f32 %v3133_v40, %v487_v42  ;;  %v691_v46 = vmax.f32 %v485_v37, 0.0 }
 0x102   :  { %v694_v45 = vmax.f32 %v496_v41, 0.0 }
 0x103   :  { %v692_v47 = vmax.f32 %v488_v43, 0.0 }
 0x104   :  { %v750_v48 = vpack.c.bf16 %v694_v45, %v693_v44 }
 0x105   :  { %v2659_v49 = vpop.f32.mrb[20].mxu0  ;;  %v749_v50 = vpack.c.bf16 %v692_v47, %v691_v46  ;;  %v3201_v46 = vcombine.low %v3126_v38, %v3126_v38 }
 0x106   :  { %v509_v51 = vadd.f32 %v2659_v49, %v3133_v40  ;;  %v500_v52 = vpop.f32.mrb[21].mxu0 }
 0x107   :  { %v501_v54 = vadd.f32 %v3133_v40, %v500_v52  ;;  %v2660_v56 = vpop.f32.mrb[22].mxu0  ;;  %2489 = vmatprep.subr.bf16.mxu1 %v749_v50 }
 0x108   :  { %v512_v57 = vadd.f32 %v2660_v56, %v3133_v40  ;;  %v503_v58 = vpop.f32.mrb[23].mxu0  ;;  %2490 = vmatpush3.bf16.msra.mxu1 %v3141_v55  ;;  %v697_v60 = vmax.f32 %v509_v51, 0.0 }
 0x109   :  { %v504_v59 = vadd.f32 %v3133_v40, %v503_v58  ;;  %2491 = vmatprep.subr.bf16.mxu1 %v750_v48  ;;  %v695_v62 = vmax.f32 %v501_v54, 0.0 }
 0x10a   :  { %v698_v61 = vmax.f32 %v512_v57, 0.0 }
 0x10b   :  { %v696_v63 = vmax.f32 %v504_v59, 0.0 }
 0x10c   :  { %v752_v0 = vpack.c.bf16 %v698_v61, %v697_v60  ;;  %2492 = vmatpush3.bf16.msra.mxu1 %v3139_v53 }
 0x10d   :  { %v751_v1 = vpack.c.bf16 %v696_v63, %v695_v62  ;;  %v2663_v2 = vpop.f32.mrb[24].mxu0 }
 0x10e   :  { %v525_v5 = vadd.f32 %v2663_v2, %v3133_v40  ;;  %v516_v7 = vpop.f32.mrb[25].mxu0 }
 0x10f   :  { %v517_v8 = vadd.f32 %v3133_v40, %v516_v7  ;;  %v2664_v9 = vpop.f32.mrb[26].mxu0  ;;  %2493 = vmatprep.subr.bf16.mxu1 %v751_v1 }
 0x110   :  { %v528_v55 = vadd.f32 %v2664_v9, %v3133_v40  ;;  %v519_v10 = vpop.f32.mrb[27].mxu0  ;;  %2494 = vmatpush3.bf16.msra.mxu1 %v3149_v4  ;;  %v701_v12 = vmax.f32 %v525_v5, 0.0 }
 0x111   :  { %v520_v11 = vadd.f32 %v3133_v40, %v519_v10  ;;  %2495 = vmatprep.subr.bf16.mxu1 %v752_v0  ;;  %v699_v53 = vmax.f32 %v517_v8, 0.0 }
 0x112   :  { %v702_v13 = vmax.f32 %v528_v55, 0.0 }
 0x113   :  { %v700_v14 = vmax.f32 %v520_v11, 0.0 }
 0x114   :  { %v754_v15 = vpack.c.bf16 %v702_v13, %v701_v12  ;;  %2496 = vmatpush3.bf16.msra.mxu1 %v3147_v3 }
 0x115   :  { %v753_v16 = vpack.c.bf16 %v700_v14, %v699_v53  ;;  %v2667_v17 = vpop.f32.mrb[28].mxu0 }
 0x116   :  { %v541_v20 = vadd.f32 %v2667_v17, %v3133_v40  ;;  %v532_v21 = vpop.f32.mrb[29].mxu0 }
 0x117   :  { %v533_v22 = vadd.f32 %v3133_v40, %v532_v21  ;;  %v2668_v23 = vpop.f32.mrb[30].mxu0  ;;  %2497 = vmatprep.subr.bf16.mxu1 %v753_v16 }
 0x118   :  { %v544_v4 = vadd.f32 %v2668_v23, %v3133_v40  ;;  %v535_v24 = vpop.f32.mrb[31].mxu0  ;;  %2498 = vmatpush3.bf16.msra.mxu1 %v3157_v19  ;;  %v705_v26 = vmax.f32 %v541_v20, 0.0 }
 0x119   :  { %v536_v25 = vadd.f32 %v3133_v40, %v535_v24  ;;  %2499 = vmatprep.subr.bf16.mxu1 %v754_v15  ;;  %v703_v3 = vmax.f32 %v533_v22, 0.0 }
 0x11a   :  { %v706_v27 = vmax.f32 %v544_v4, 0.0 }
 0x11b   :  { %v704_v28 = vmax.f32 %v536_v25, 0.0 }
 0x11c   :  { %v756_v29 = vpack.c.bf16 %v706_v27, %v705_v26  ;;  %2500 = vmatpush3.bf16.msra.mxu1 %v3155_v18  ;;  %v3197_v18 = vld [vmem:[%s3704_s1 + $0x8] sm:$0xff] }
 0x11d   :  { %v755_v30 = vpack.c.bf16 %v704_v28, %v703_v3  ;;  %v2671_v31 = vpop.f32.mrb[32].mxu0 }
 0x11e   :  { %v557_v34 = vadd.f32 %v2671_v31, %v3133_v40  ;;  %v548_v35 = vpop.f32.mrb[33].mxu0 }
 0x11f   :  { %v549_v36 = vadd.f32 %v3133_v40, %v548_v35  ;;  %v2672_v37 = vpop.f32.mrb[34].mxu0  ;;  %2501 = vmatprep.subr.bf16.mxu1 %v755_v30 }
 0x120   :  { %v560_v19 = vadd.f32 %v2672_v37, %v3133_v40  ;;  %v551_v39 = vpop.f32.mrb[35].mxu0  ;;  %2502 = vmatpush3.bf16.msra.mxu1 %v3165_v33  ;;  %v709_v42 = vmax.f32 %v557_v34, 0.0  ;;  %v3208_v33 = vcombine.high %v3197_v18, %v3197_v18 }
 0x121   :  { %v552_v41 = vadd.f32 %v3133_v40, %v551_v39  ;;  %2503 = vmatprep.subr.bf16.mxu1 %v756_v29  ;;  %v707_v44 = vmax.f32 %v549_v36, 0.0 }
 0x122   :  { %v710_v43 = vmax.f32 %v560_v19, 0.0 }
 0x123   :  { %v708_v45 = vmax.f32 %v552_v41, 0.0 }
 0x124   :  { %v3203_v47 = vpack.c.bf16 %v710_v43, %v709_v42  ;;  %2504 = vmatpush3.bf16.msra.mxu1 %v3163_v32 }
 0x125   :  { %v3210_v48 = vpack.c.bf16 %v708_v45, %v707_v44  ;;  %v2675_v49 = vpop.f32.mrb[36].mxu0 }
 0x126   :  { %v573_v50 = vadd.f32 %v2675_v49, %v3133_v40  ;;  %v564_v51 = vpop.f32.mrb[37].mxu0 }
 0x127   :  { %v565_v52 = vadd.f32 %v3133_v40, %v564_v51  ;;  %v2676_v54 = vpop.f32.mrb[38].mxu0  ;;  %820 = vmatmul.mubr.bf16.vlgmr.msra.gmra.mrb[0].mxu1 %v3201_v46 }
 0x128   :  { %v576_v38 = vadd.f32 %v2676_v54, %v3133_v40  ;;  %v567_v56 = vpop.f32.mrb[39].mxu0  ;;  %859 = vmatprep.mubr.bf16.mxu1 %v3208_v33  ;;  %v713_v57 = vmax.f32 %v573_v50, 0.0 }
 0x129   :  { %v568_v32 = vadd.f32 %v3133_v40, %v567_v56  ;;  %v711_v59 = vmax.f32 %v565_v52, 0.0 }
 0x12a   :  { %v714_v58 = vmax.f32 %v576_v38, 0.0 }
 0x12b   :  { %v712_v60 = vmax.f32 %v568_v32, 0.0 }
 0x12c   :  { %v3218_v61 = vpack.c.bf16 %v714_v58, %v713_v57 }
 0x12d   :  { %v3220_v62 = vpack.c.bf16 %v712_v60, %v711_v59  ;;  %v2679_v63 = vpop.f32.mrb[40].mxu0 }
 0x12e   :  { %v589_v0 = vadd.f32 %v2679_v63, %v3133_v40  ;;  %v580_v1 = vpop.f32.mrb[41].mxu0 }
 0x12f   :  { %v581_v2 = vadd.f32 %v3133_v40, %v580_v1  ;;  %v2680_v5 = vpop.f32.mrb[42].mxu0 }
 0x130   :  { %v592_v7 = vadd.f32 %v2680_v5, %v3133_v40  ;;  %v583_v8 = vpop.f32.mrb[43].mxu0  ;;  %v717_v55 = vmax.f32 %v589_v0, 0.0 }
 0x131   :  { %v584_v9 = vadd.f32 %v3133_v40, %v583_v8  ;;  %v715_v11 = vmax.f32 %v581_v2, 0.0 }
 0x132   :  { %v718_v10 = vmax.f32 %v592_v7, 0.0 }
 0x133   :  { %v716_v12 = vmax.f32 %v584_v9, 0.0 }
 0x134   :  { %v3226_v13 = vpack.c.bf16 %v718_v10, %v717_v55 }
 0x135   :  { %v3228_v53 = vpack.c.bf16 %v716_v12, %v715_v11  ;;  %v2683_v14 = vpop.f32.mrb[44].mxu0 }
 0x136   :  { %v605_v15 = vadd.f32 %v2683_v14, %v3133_v40  ;;  %v596_v16 = vpop.f32.mrb[45].mxu0 }
 0x137   :  { %v597_v17 = vadd.f32 %v3133_v40, %v596_v16  ;;  %v2684_v20 = vpop.f32.mrb[46].mxu0 }
 0x138   :  { %v608_v21 = vadd.f32 %v2684_v20, %v3133_v40  ;;  %v599_v22 = vpop.f32.mrb[47].mxu0  ;;  %v721_v4 = vmax.f32 %v605_v15, 0.0 }
 0x139   :  { %v600_v23 = vadd.f32 %v3133_v40, %v599_v22  ;;  %v719_v25 = vmax.f32 %v597_v17, 0.0 }
 0x13a   :  { %v722_v24 = vmax.f32 %v608_v21, 0.0 }
 0x13b   :  { %v720_v26 = vmax.f32 %v600_v23, 0.0 }
 0x13c   :  { %v3234_v27 = vpack.c.bf16 %v722_v24, %v721_v4 }
 0x13d   :  { %v3236_v3 = vpack.c.bf16 %v720_v26, %v719_v25  ;;  %v2687_v28 = vpop.f32.mrb[48].mxu0 }
 0x13e   :  { %v621_v29 = vadd.f32 %v2687_v28, %v3133_v40  ;;  %v612_v30 = vpop.f32.mrb[49].mxu0 }
 0x13f   :  { %v613_v31 = vadd.f32 %v3133_v40, %v612_v30  ;;  %v2688_v34 = vpop.f32.mrb[50].mxu0  ;;  %v2928_v30 = vmov 0.0  }
 0x140   :  { %v624_v35 = vadd.f32 %v2688_v34, %v3133_v40  ;;  %v615_v36 = vpop.f32.mrb[51].mxu0  ;;  %v725_v19 = vmax.f32 %v621_v29, 0.0  ;;  %v3263_v29 = vcombine.low %v3197_v18, %v3197_v18  ;;  %v3278_v18 = vld [vmem:[%s3706_s4 + $0x8] sm:$0xff]  }
 0x141   :  { %v616_v37 = vadd.f32 %v3133_v40, %v615_v36  ;;  %v723_v41 = vmax.f32 %v613_v31, 0.0 }
 0x142   :  { %v726_v39 = vmax.f32 %v624_v35, 0.0 }
 0x143   :  { %v724_v42 = vmax.f32 %v616_v37, 0.0 }
 0x144   :  { %v766_v43 = vpack.c.bf16 %v726_v39, %v725_v19 }
 0x145   :  { %v765_v44 = vpack.c.bf16 %v724_v42, %v723_v41  ;;  %v2691_v45 = vpop.f32.mrb[52].mxu0 }
 0x146   :  { %v637_v49 = vadd.f32 %v2691_v45, %v3133_v40  ;;  %v628_v50 = vpop.f32.mrb[53].mxu0  ;;  %v873_v45 = vlaneseq }
 0x147   :  { %v629_v51 = vadd.f32 %v3133_v40, %v628_v50  ;;  %v2692_v52 = vpop.f32.mrb[54].mxu0  ;;  %2511 = vmatprep.subr.bf16.mxu1 %v765_v44  ;;  %v3297_v44 = vld [vmem:[%s3707_s5 + $0x8] sm:$0xff]  }
 0x148   :  { %v640_v54 = vadd.f32 %v2692_v52, %v3133_v40  ;;  %v631_v38 = vpop.f32.mrb[55].mxu0  ;;  %2512 = vmatpush3.bf16.msra.mxu1 %v3210_v48  ;;  %v729_v32 = vmax.f32 %v637_v49, 0.0  ;;  %v3301_v49 = vshrl.u32 %v873_v45, 7 }
 0x149   :  { %v632_v56 = vadd.f32 %v3133_v40, %v631_v38  ;;  %2513 = vmatprep.subr.bf16.mxu1 %v766_v43  ;;  %v727_v58 = vmax.f32 %v629_v51, 0.0  ;;  %v3290_v43 = vld [vmem:[%s3707_s5] sm:$0xff]  }
 0x14a   :  { %v730_v57 = vmax.f32 %v640_v54, 0.0  ;;  %v875_v50 = vsub.s32 0, %v3301_v49  ;;  %v867_v51 = vld [vmem:[%s3708_s6] sm:$0xf] }
 0x14b   :  { %v728_v59 = vmax.f32 %v632_v56, 0.0 }
 0x14c   :  { %v768_v60 = vpack.c.bf16 %v730_v57, %v729_v32  ;;  %2514 = vmatpush3.bf16.msra.mxu1 %v3203_v47  ;;  %v3309_v52 = vrot.slane %v867_v51, %v875_v50 }
 0x14d   :  { %v767_v63 = vpack.c.bf16 %v728_v59, %v727_v58  ;;  %v2695_v0 = vpop.f32.mrb[56].mxu0 }
 0x14e   :  { %v653_v1 = vadd.f32 %v2695_v0, %v3133_v40  ;;  %v644_v2 = vpop.f32.mrb[57].mxu0 }
 0x14f   :  { %v645_v5 = vadd.f32 %v3133_v40, %v644_v2  ;;  %v2696_v7 = vpop.f32.mrb[58].mxu0  ;;  %2515 = vmatprep.subr.bf16.mxu1 %v767_v63 }
 0x150   :  { %v656_v48 = vadd.f32 %v2696_v7, %v3133_v40  ;;  %v647_v8 = vpop.f32.mrb[59].mxu0  ;;  %2516 = vmatpush3.bf16.msra.mxu1 %v3220_v62  ;;  %v733_v55 = vmax.f32 %v653_v1, 0.0 }
 0x151   :  { %v648_v9 = vadd.f32 %v3133_v40, %v647_v8  ;;  %2517 = vmatprep.subr.bf16.mxu1 %v768_v60  ;;  %v731_v47 = vmax.f32 %v645_v5, 0.0 }
 0x152   :  { %v734_v10 = vmax.f32 %v656_v48, 0.0 }
 0x153   :  { %v732_v11 = vmax.f32 %v648_v9, 0.0 }
 0x154   :  { %v770_v12 = vpack.c.bf16 %v734_v10, %v733_v55  ;;  %2518 = vmatpush3.bf16.msra.mxu1 %v3218_v61 }
 0x155   :  { %v769_v14 = vpack.c.bf16 %v732_v11, %v731_v47  ;;  %v2699_v15 = vpop.f32.mrb[60].mxu0 }
 0x156   :  { %v669_v16 = vadd.f32 %v2699_v15, %v3133_v40  ;;  %v660_v17 = vpop.f32.mrb[61].mxu0 }
 0x157   :  { %v661_v20 = vadd.f32 %v3133_v40, %v660_v17  ;;  %v2700_v21 = vpop.f32.mrb[62].mxu0  ;;  %2519 = vmatprep.subr.bf16.mxu1 %v769_v14  ;;  %v962_v17 = vsub.s32 2, %v3301_v49 }
 0x158   :  { %v672_v62 = vadd.f32 %v2700_v21, %v3133_v40  ;;  %v663_v22 = vpop.f32.mrb[63].mxu0  ;;  %2520 = vmatpush3.bf16.msra.mxu1 %v3228_v53  ;;  %v737_v4 = vmax.f32 %v669_v16, 0.0  ;;  %v3270_v53 = vld [vmem:[%s3706_s4] sm:$0xff]   ;;  %v957_v16 = vsub.s32 1, %v3301_v49 }
 0x159   :  { %v664_v23 = vadd.f32 %v3133_v40, %v663_v22  ;;  %2521 = vmatprep.subr.bf16.mxu1 %v770_v12  ;;  %v735_v61 = vmax.f32 %v661_v20, 0.0  ;;  %v3322_v22 = vrot.slane %v867_v51, %v962_v17 }
 0x15a   :  { %v738_v24 = vmax.f32 %v672_v62, 0.0  ;;  %v3318_v20 = vrot.slane %v867_v51, %v957_v16 }
 0x15b   :  { %v736_v25 = vmax.f32 %v664_v23, 0.0 }
 0x15c   :  { %v772_v26 = vpack.c.bf16 %v738_v24, %v737_v4  ;;  %2522 = vmatpush3.bf16.msra.mxu1 %v3226_v13 }
 0x15d   :  { %v771_v28 = vpack.c.bf16 %v736_v25, %v735_v61  ;;  %v3332_v25 = vld [vmem:[%s3709_s7] sm:$0xff]  }
 0x15f   :  { %2523 = vmatprep.subr.bf16.mxu1 %v771_v28 }
 0x160   :  { %2524 = vmatpush3.bf16.msra.mxu1 %v3236_v3 }
 0x161   :  { %2525 = vmatprep.subr.bf16.mxu1 %v772_v26  ;;  %v973_v26 = vsub.s32 3, %v3301_v49 }
 0x163   :  { %v3339_v28 = vrot.slane %v867_v51, %v973_v26 }
 0x164   :  { %2526 = vmatpush3.bf16.msra.mxu1 %v3234_v27 }
 0x165   :  { %2701 = vmatprep.subr.bf16.mxu1 %v2928_v30 }
 0x167   :  { %860 = vmatmul.mubr.bf16.vlgmr.msra.gmra.mrb[4].mxu1 %v3263_v29 }
 0x168   :  { %2702 = vmatpush3.bf16.msra.mxu1 %v3270_v53  ;;  %2705 = vmatprep.mubr.msk.bf16.mxu1 %vm2929_vm3, %v2928_v30 }
 0x169   :  { %2703 = vmatprep.subr.bf16.mxu1 %v2928_v30 }
 0x16c   :  { %2704 = vmatpush3.bf16.msra.mxu1 %v3278_v18 }
 0x16d   :  { %2709 = vmatprep.subr.bf16.mxu1 %v2928_v30 }
 0x1fa   :  { %v2505_v13 = vpop.f32.mrb[0].mxu1 }
 0x1fb   :  { %v2506_v27 = vpop.f32.mrb[1].mxu1 }
 0x1fc   :  { %v2507_v3 = vadd.f32 %v2506_v27, %v2505_v13  ;;  %v2508_v31 = vpop.f32.mrb[2].mxu1 }
 0x1fd   :  { %v2509_v34 = vpop.f32.mrb[3].mxu1 }
 0x23a   :  { %v2527_v35 = vpop.f32.mrb[4].mxu1 }
 0x23b   :  { %v2528_v36 = vpop.f32.mrb[5].mxu1 }
 0x23c   :  { %v2529_v37 = vadd.f32 %v2528_v36, %v2527_v35  ;;  %v2530_v19 = vpop.f32.mrb[6].mxu1 }
 0x23d   :  { %v2531_v39 = vpop.f32.mrb[7].mxu1  ;;  %v3355_v19 = vld [vmem:[%s3710_s8] sm:$0xff]  }
 0x23e   :  { %v862_v41 = vadd.f32 %v2529_v37, %v2507_v3  ;;  %v3362_v39 = vld [vmem:[%s3710_s8 + $0x8] sm:$0xff]  }
 0x240   :  { %v868_v42 = vpack.c.bf16 %v862_v41, %v862_v41  ;;  %v2925_v41 = vld [vmem:[%s3702_s2] sm:$0xff]  }
 0x242   :  { %2706 = vmatmul.mubr.msk.bf16.vlgmr.msra.gmra.mrb[8].mxu1 %vm889_vm4, %v868_v42  ;;  %v3371_v42 = vld [vmem:[%s3711_s9] sm:$0xf] }
 0x243   :  { %2713 = vmatprep.mubr.msk.bf16.mxu1 %vm2929_vm3, %v2928_v30  ;;  %2710 = vmatpush3.bf16.msra.mxu1 %v3290_v43  ;;  %v3376_v45 = vrot.slane %v3371_v42, %v875_v50 }
 0x244   :  { %2711 = vmatprep.subr.bf16.mxu1 %v2928_v30 }
 0x247   :  { %2712 = vmatpush3.bf16.msra.mxu1 %v3297_v44 }
 0x248   :  { %2717 = vmatprep.subr.bf16.mxu1 %v2928_v30 }
 0x315   :  { %v927_v54 = vpop.f32.mrb[8].mxu1 }
 0x316   :  { %v928_v38 = vadd.f32 %v927_v54, %v3309_v52  ;;  %v2707_v56 = vpop.f32.mrb[9].mxu1 }
 0x317   :  { %v930_v32 = vpop.f32.mrb[10].mxu1 }
 0x318   :  { %v933_v57 = vsel %vm889_vm4, %v928_v38, 0.0  ;;  %v2708_v58 = vpop.f32.mrb[11].mxu1 }
 0x319   :  { %v934_v59 = vrot.slane %v933_v57, 4 }
 0x31b   :  { %v935_v60 = vadd.f32 %v934_v59, %v933_v57 }
 0x31d   :  { %v936_v63 = vrot.slane %v935_v60, 2 }
 0x31f   :  { %v937_v0 = vadd.f32 %v936_v63, %v935_v60 }
 0x321   :  { %v938_v1 = vrot.slane %v937_v0, 1 }
 0x323   :  { %v939_v2 = vadd.f32 %v938_v1, %v937_v0 }
 0x325   :  { %v941_v5 = vmul.f32 0.125, %v939_v2 }
 0x327   :  { %v942_v7 = vsub.f32 %v928_v38, %v941_v5 }
 0x329   :  { %v943_v48 = vmul.f32 %v942_v7, %v942_v7 }
 0x32b   :  { %v944_v8 = vsel %vm889_vm4, %v943_v48, 0.0 }
 0x32c   :  { %v945_v9 = vrot.slane %v944_v8, 4 }
 0x32e   :  { %v946_v55 = vadd.f32 %v945_v9, %v944_v8 }
 0x330   :  { %v947_v10 = vrot.slane %v946_v55, 2 }
 0x332   :  { %v948_v47 = vadd.f32 %v947_v10, %v946_v55 }
 0x334   :  { %v949_v11 = vrot.slane %v948_v47, 1 }
 0x336   :  { %v950_v12 = vadd.f32 %v949_v11, %v948_v47 }
 0x338   :  { %v951_v14 = vmul.f32 0.125, %v950_v12 }
 0x33a   :  { %v952_v15 = vadd.f32 1e-05, %v951_v14  ;;  %v3384_v14 = vrot.slane %v3371_v42, %v957_v16  ;;  %v2878_v16 = vld [vmem:[%s3703_s0 + $0x108] sm:$0xff]  }
 0x33c   :  { %2909 = vrsqrt.f32 %v952_v15 }
 0x346   :  { %v2910_v21 = vpop.eup %2909 }
 0x347   :  { %v954_v62 = vmul.f32 %v2910_v21, %v942_v7 }
 0x349   :  { %v959_v23 = vmul.f32 %v3318_v20, %v954_v62  ;;  %v3389_v62 = vrot.slane %v3371_v42, %v962_v17  ;;  %v2879_v17 = vld [vmem:[%s3703_s0 + $0x110] sm:$0xff]  }
 0x34b   :  { %v964_v4 = vadd.f32 %v3322_v22, %v959_v23 }
 0x34d   :  { %v965_v24 = vmax.f32 %v964_v4, 0.0 }
 0x34f   :  { %v966_v61 = vpack.c.bf16 %v965_v24, %v965_v24 }
 0x351   :  { %2714 = vmatmul.mubr.msk.bf16.vlgmr.msra.gmra.mrb[12].mxu1 %vm889_vm4, %v966_v61  ;;  %v2877_v61 = vld [vmem:[%s3703_s0 + $0x100] sm:$0xff]  }
 0x352   :  { %2719 = vmatprep.mubr.msk.bf16.mxu1 %vm2929_vm3, %v2928_v30  ;;  %2718 = vmatpush3.bf16.msra.mxu1 %v3332_v25 }
 0x353   :  { %2723 = vmatprep.subr.bf16.mxu1 %v2928_v30 }
 0x424   :  { %v1024_v13 = vpop.f32.mrb[12].mxu1 }
 0x425   :  { %v3342_v27 = vadd.f32 %v1024_v13, %v3339_v28  ;;  %v2715_v3 = vpop.f32.mrb[13].mxu1 }
 0x426   :  { %v1027_v31 = vpop.f32.mrb[14].mxu1  ;;  %v2880_v3 = vld [vmem:[%s3703_s0 + $0x118] sm:$0xff]  }
 0x427   :  { %v1031_v34 = vpack.c.bf16 %v3342_v27, %v3342_v27  ;;  %v2716_v35 = vpop.f32.mrb[15].mxu1  ;;  %v2208_v36 = vmul.f32 %v3342_v27, %v3342_v27  ;;  %v2881_v31 = vld [vmem:[%s3703_s0 + $0x120] sm:$0xff]  }
 0x428   :  { %v2884_v35 = vld [vmem:[%s3703_s0 + $0x138] sm:$0xff]  }
 0x429   :  { %2720 = vmatmul.mubr.msk.bf16.vlgmr.msra.gmra.mrb[16].mxu1 %vm1044_vm5, %v1031_v34  ;;  %v2209_v37 = vsel %vm1044_vm5, %v2208_v36, 0.0  ;;  %v2883_v34 = vld [vmem:[%s3703_s0 + $0x130] sm:$0xff]   ;;  %v2885_v36 = vld [vmem:[%s3703_s0 + $0x140] sm:$0xff]  }
 0x42a   :  { %2210 = vadd.xlane.f32.xlu1 %v2209_v37  ;;  %2727 = vmatprep.mubr.msk.bf16.mxu1 %vm2929_vm3, %v2928_v30  ;;  %v2886_v37 = vld [vmem:[%s3703_s0 + $0x148] sm:$0xff]  }
 0x42b   :  { %2724 = vmatpush3.bf16.msra.mxu1 %v3355_v19 }
 0x42c   :  { %2725 = vmatprep.subr.bf16.mxu1 %v2928_v30 }
 0x42f   :  { %2726 = vmatpush3.bf16.msra.mxu1 %v3362_v39 }
 0x430   :  { %2731 = vmatprep.subr.bf16.mxu1 %v2925_v41 }
 0x4fc   :  { %v1082_v51 = vpop.f32.mrb[16].mxu1 }
 0x4fd   :  { %v1083_v54 = vadd.f32 %v1082_v51, %v3376_v45  ;;  %v2721_v38 = vpop.f32.mrb[17].mxu1  ;;  %v2888_v51 = vld [vmem:[%s3703_s0 + $0x158] sm:$0xff]  }
 0x4fe   :  { %v1085_v56 = vpop.f32.mrb[18].mxu1  ;;  %v2890_v38 = vld [vmem:[%s3703_s0 + $0x168] sm:$0xff]  }
 0x4ff   :  { %v1088_v32 = vsel %vm889_vm4, %v1083_v54, 0.0  ;;  %v2722_v57 = vpop.f32.mrb[19].mxu1  ;;  %v2891_v56 = vld [vmem:[%s3703_s0 + $0x170] sm:$0xff]  }
 0x500   :  { %v1089_v58 = vrot.slane %v1088_v32, 4  ;;  %v2893_v57 = vld [vmem:[%s3703_s0 + $0x180] sm:$0xff]  }
 0x502   :  { %v1090_v59 = vadd.f32 %v1089_v58, %v1088_v32  ;;  %v2892_v32 = vld [vmem:[%s3703_s0 + $0x178] sm:$0xff]   ;;  %v2894_v58 = vld [vmem:[%s3703_s0 + $0x188] sm:$0xff]  }
 0x504   :  { %v1091_v60 = vrot.slane %v1090_v59, 2 }
 0x506   :  { %v1092_v63 = vadd.f32 %v1091_v60, %v1090_v59  ;;  %v2895_v59 = vld [vmem:[%s3703_s0 + $0x190] sm:$0xff]   ;;  %v2896_v60 = vld [vmem:[%s3703_s0 + $0x198] sm:$0xff]  }
 0x508   :  { %v1093_v0 = vrot.slane %v1092_v63, 1 }
 0x50a   :  { %v1094_v1 = vadd.f32 %v1093_v0, %v1092_v63  ;;  %v2897_v63 = vld [vmem:[%s3703_s0 + $0x1a0] sm:$0xff]   ;;  %v2898_v0 = vld [vmem:[%s3703_s0 + $0x1a8] sm:$0xff]  }
 0x50c   :  { %v1095_v2 = vmul.f32 0.125, %v1094_v1  ;;  %v2899_v1 = vld [vmem:[%s3703_s0 + $0x1b0] sm:$0xff]  }
 0x50e   :  { %v1096_v5 = vsub.f32 %v1083_v54, %v1095_v2  ;;  %v2889_v54 = vld [vmem:[%s3703_s0 + $0x160] sm:$0xff]   ;;  %v2900_v2 = vld [vmem:[%s3703_s0 + $0x1b8] sm:$0xff]  }
 0x510   :  { %v1097_v7 = vmul.f32 %v1096_v5, %v1096_v5 }
 0x512   :  { %v1098_v50 = vsel %vm889_vm4, %v1097_v7, 0.0  ;;  %v2902_v7 = vld [vmem:[%s3703_s0 + $0x1c8] sm:$0xff]  }
 0x513   :  { %v1099_v48 = vrot.slane %v1098_v50, 4 }
 0x515   :  { %v1100_v8 = vadd.f32 %v1099_v48, %v1098_v50  ;;  %v2903_v50 = vld [vmem:[%s3703_s0 + $0x1d0] sm:$0xff]   ;;  %v2904_v48 = vld [vmem:[%s3703_s0 + $0x1d8] sm:$0xff]  }
 0x517   :  { %v1101_v9 = vrot.slane %v1100_v8, 2 }
 0x519   :  { %v1102_v55 = vadd.f32 %v1101_v9, %v1100_v8  ;;  %v2905_v8 = vld [vmem:[%s3703_s0 + $0x1e0] sm:$0xff]   ;;  %v2906_v9 = vld [vmem:[%s3703_s0 + $0x1e8] sm:$0xff]  }
 0x51b   :  { %v1103_v10 = vrot.slane %v1102_v55, 1 }
 0x51d   :  { %v1104_v47 = vadd.f32 %v1103_v10, %v1102_v55  ;;  %v2907_v55 = vld [vmem:[%s3703_s0 + $0x1f0] sm:$0xff]   ;;  %v2908_v10 = vld [vmem:[%s3703_s0 + $0x1f8] sm:$0xff]  }
 0x51f   :  { %v1105_v11 = vmul.f32 0.125, %v1104_v47  ;;  %v3527_v47 = vrot.slane %v3371_v42, %v973_v26 }
 0x521   :  { %v1106_v12 = vadd.f32 1e-05, %v1105_v11 }
 0x523   :  { %2911 = vrsqrt.f32 %v1106_v12 }
 0x52d   :  { %v2912_v15 = vpop.eup %2911 }
 0x52e   :  { %v1108_v21 = vmul.f32 %v2912_v15, %v1096_v5  ;;  %v2901_v5 = vld [vmem:[%s3703_s0 + $0x1c0] sm:$0xff]  }
 0x530   :  { %v1113_v23 = vmul.f32 %v3384_v14, %v1108_v21 }
 0x532   :  { %v1118_v4 = vadd.f32 %v3389_v62, %v1113_v23 }
 0x534   :  { %v1119_v24 = vmax.f32 %v1118_v4, 0.0 }
 0x536   :  { %v1120_v13 = vpack.c.bf16 %v1119_v24, %v1119_v24 }
 0x538   :  { %2728 = vmatmul.mubr.msk.bf16.vlgmr.msra.gmra.mrb[20].mxu1 %vm889_vm4, %v1120_v13 }
 0x539   :  { %2732 = vmatpush3.bf16.msra.mxu1 %v2925_v41  ;;  %2735 = vmatprep.mubr.msk.bf16.mxu1 %vm282_vm2, %v2877_v61  ;;  %v2887_v41 = vld [vmem:[%s3703_s0 + $0x150] sm:$0xff]  }
 0x53a   :  { %2733 = vmatprep.subr.bf16.mxu1 %v2994_v6 }
 0x53d   :  { %2734 = vmatpush3.bf16.msra.mxu1 %v2994_v6  ;;  %v2882_v6 = vld [vmem:[%s3703_s0 + $0x128] sm:$0xff]  }
 0x540   :  { %2736 = vmatmul.mubr.msk.bf16.vlgmr.msra.gmra.mrb[24].mxu1 %vm282_vm2, %v2878_v16 }
 0x541   :  { %2739 = vmatprep.mubr.msk.bf16.mxu1 %vm282_vm2, %v2879_v17 }
 0x548   :  { %2740 = vmatmul.mubr.msk.bf16.gmra.mrb[28].mxu1 %vm282_vm2, %v2880_v3 }
 0x549   :  { %2743 = vmatprep.mubr.msk.bf16.mxu1 %vm282_vm2, %v2881_v31 }
 0x550   :  { %2744 = vmatmul.mubr.msk.bf16.gmra.mrb[32].mxu1 %vm282_vm2, %v2882_v6 }
 0x551   :  { %2747 = vmatprep.mubr.msk.bf16.mxu1 %vm282_vm2, %v2883_v34 }
 0x558   :  { %2748 = vmatmul.mubr.msk.bf16.gmra.mrb[36].mxu1 %vm282_vm2, %v2884_v35 }
 0x559   :  { %2751 = vmatprep.mubr.msk.bf16.mxu1 %vm282_vm2, %v2885_v36 }
 0x560   :  { %2752 = vmatmul.mubr.msk.bf16.gmra.mrb[40].mxu1 %vm282_vm2, %v2886_v37 }
 0x561   :  { %2755 = vmatprep.mubr.msk.bf16.mxu1 %vm282_vm2, %v2887_v41 }
 0x568   :  { %2756 = vmatmul.mubr.msk.bf16.gmra.mrb[44].mxu1 %vm282_vm2, %v2888_v51 }
 0x569   :  { %2759 = vmatprep.mubr.msk.bf16.mxu1 %vm282_vm2, %v2889_v54 }
 0x570   :  { %2760 = vmatmul.mubr.msk.bf16.gmra.mrb[48].mxu1 %vm282_vm2, %v2890_v38 }
 0x571   :  { %2763 = vmatprep.mubr.msk.bf16.mxu1 %vm282_vm2, %v2891_v56 }
 0x578   :  { %2764 = vmatmul.mubr.msk.bf16.gmra.mrb[52].mxu1 %vm282_vm2, %v2892_v32 }
 0x579   :  { %2767 = vmatprep.mubr.msk.bf16.mxu1 %vm282_vm2, %v2893_v57 }
 0x580   :  { %2768 = vmatmul.mubr.msk.bf16.gmra.mrb[56].mxu1 %vm282_vm2, %v2894_v58  ;;  %v3549_v58 = vld [vmem:[%s3705_s3] ss:$0 sm:$0xff] }
 0x581   :  { %2771 = vmatprep.mubr.msk.bf16.mxu1 %vm282_vm2, %v2895_v59 }
 0x588   :  { %2772 = vmatmul.mubr.msk.bf16.gmra.mrb[60].mxu1 %vm282_vm2, %v2896_v60 }
 0x589   :  { %2775 = vmatprep.mubr.msk.bf16.mxu1 %vm282_vm2, %v2897_v63 }
 0x590   :  { %2776 = vmatmul.mubr.msk.bf16.gmra.mrb[64].mxu1 %vm282_vm2, %v2898_v0 }
 0x591   :  { %2779 = vmatprep.mubr.msk.bf16.mxu1 %vm282_vm2, %v2899_v1 }
 0x598   :  { %2780 = vmatmul.mubr.msk.bf16.gmra.mrb[68].mxu1 %vm282_vm2, %v2900_v2 }
 0x599   :  { %2783 = vmatprep.mubr.msk.bf16.mxu1 %vm282_vm2, %v2901_v5 }
 0x5a0   :  { %2784 = vmatmul.mubr.msk.bf16.gmra.mrb[72].mxu1 %vm282_vm2, %v2902_v7 }
 0x5a1   :  { %2787 = vmatprep.mubr.msk.bf16.mxu1 %vm282_vm2, %v2903_v50 }
 0x5a8   :  { %2788 = vmatmul.mubr.msk.bf16.gmra.mrb[76].mxu1 %vm282_vm2, %v2904_v48 }
 0x5a9   :  { %2791 = vmatprep.mubr.msk.bf16.mxu1 %vm282_vm2, %v2905_v8 }
 0x5b0   :  { %2792 = vmatmul.mubr.msk.bf16.gmra.mrb[80].mxu1 %vm282_vm2, %v2906_v9 }
 0x5b1   :  { %2795 = vmatprep.mubr.msk.bf16.mxu1 %vm282_vm2, %v2907_v55 }
 0x5b8   :  { %2796 = vmatmul.mubr.msk.bf16.gmra.mrb[84].mxu1 %vm282_vm2, %v2908_v10 }
 0x60b   :  { %v1178_v11 = vpop.f32.mrb[20].mxu1 }
 0x60c   :  { %v3530_v12 = vadd.f32 %v1178_v11, %v3527_v47  ;;  %v2729_v15 = vpop.f32.mrb[21].mxu1 }
 0x60d   :  { %v1181_v21 = vpop.f32.mrb[22].mxu1 }
 0x60e   :  { %v2730_v23 = vpop.f32.mrb[23].mxu1  ;;  %v2194_v4 = vmul.f32 %v3530_v12, %v3530_v12 }
 0x610   :  { %v2195_v24 = vsel %vm1044_vm5, %v2194_v4, 0.0 }
 0x611   :  { %2196 = vadd.xlane.f32.xlu0 %v2195_v24 }
 0x613   :  { %v2737_v61 = vpop.f32.mrb[24].mxu1 }
 0x614   :  { %v1548_v13 = vadd.f32 %v2737_v61, %v3133_v40  ;;  %v1539_v49 = vpop.f32.mrb[25].mxu1 }
 0x615   :  { %v1540_v26 = vadd.f32 %v3133_v40, %v1539_v49  ;;  %v2738_v42 = vpop.f32.mrb[26].mxu1 }
 0x616   :  { %v1551_v16 = vadd.f32 %v2738_v42, %v3133_v40  ;;  %v1542_v17 = vpop.f32.mrb[27].mxu1  ;;  %v1796_v31 = vmax.f32 %v1548_v13, 0.0 }
 0x617   :  { %v1543_v3 = vadd.f32 %v3133_v40, %v1542_v17  ;;  %v1794_v34 = vmax.f32 %v1540_v26, 0.0 }
 0x618   :  { %v1797_v6 = vmax.f32 %v1551_v16, 0.0 }
 0x619   :  { %v1795_v35 = vmax.f32 %v1543_v3, 0.0 }
 0x61a   :  { %v3539_v36 = vpack.c.bf16 %v1797_v6, %v1796_v31 }
 0x61b   :  { %v3541_v37 = vpack.c.bf16 %v1795_v35, %v1794_v34  ;;  %v2741_v41 = vpop.f32.mrb[28].mxu1 }
 0x61c   :  { %v1564_v51 = vadd.f32 %v2741_v41, %v3133_v40  ;;  %v1555_v54 = vpop.f32.mrb[29].mxu1 }
 0x61d   :  { %v1556_v38 = vadd.f32 %v3133_v40, %v1555_v54  ;;  %v2742_v56 = vpop.f32.mrb[30].mxu1 }
 0x61e   :  { %v1567_v32 = vadd.f32 %v2742_v56, %v3133_v40  ;;  %v1558_v57 = vpop.f32.mrb[31].mxu1  ;;  %v1800_v60 = vmax.f32 %v1564_v51, 0.0 }
 0x61f   :  { %v1559_v59 = vadd.f32 %v3549_v58, %v1558_v57  ;;  %v1798_v0 = vmax.f32 %v1556_v38, 0.0 }
 0x620   :  { %v1801_v63 = vmax.f32 %v1567_v32, 0.0 }
 0x621   :  { %v1799_v1 = vmax.f32 %v1559_v59, 0.0 }
 0x622   :  { %v3552_v2 = vpack.c.bf16 %v1801_v63, %v1800_v60 }
 0x623   :  { %v3554_v5 = vpack.c.bf16 %v1799_v1, %v1798_v0  ;;  %v2745_v7 = vpop.f32.mrb[32].mxu1 }
 0x624   :  { %v1580_v50 = vadd.f32 %v3549_v58, %v2745_v7  ;;  %v1571_v40 = vpop.f32.mrb[33].mxu1 }
 0x625   :  { %v1572_v48 = vadd.f32 %v3549_v58, %v1571_v40  ;;  %v2746_v8 = vpop.f32.mrb[34].mxu1 }
 0x626   :  { %v1583_v9 = vadd.f32 %v3549_v58, %v2746_v8  ;;  %v1574_v55 = vpop.f32.mrb[35].mxu1  ;;  %v1804_v11 = vmax.f32 %v1580_v50, 0.0 }
 0x627   :  { %v1575_v10 = vadd.f32 %v3549_v58, %v1574_v55  ;;  %v1802_v21 = vmax.f32 %v1572_v48, 0.0 }
 0x628   :  { %v1805_v15 = vmax.f32 %v1583_v9, 0.0 }
 0x629   :  { %v1803_v23 = vmax.f32 %v1575_v10, 0.0 }
 0x62a   :  { %v3560_v4 = vpack.c.bf16 %v1805_v15, %v1804_v11 }
 0x62b   :  { %v3562_v24 = vpack.c.bf16 %v1803_v23, %v1802_v21  ;;  %v2749_v61 = vpop.f32.mrb[36].mxu1 }
 0x62c   :  { %v1596_v13 = vadd.f32 %v3549_v58, %v2749_v61  ;;  %v1587_v49 = vpop.f32.mrb[37].mxu1 }
 0x62d   :  { %v1588_v26 = vadd.f32 %v3549_v58, %v1587_v49  ;;  %v2750_v42 = vpop.f32.mrb[38].mxu1 }
 0x62e   :  { %v1599_v16 = vadd.f32 %v3549_v58, %v2750_v42  ;;  %v1590_v17 = vpop.f32.mrb[39].mxu1  ;;  %v1808_v31 = vmax.f32 %v1596_v13, 0.0 }
 0x62f   :  { %v1591_v3 = vadd.f32 %v3549_v58, %v1590_v17  ;;  %v1806_v34 = vmax.f32 %v1588_v26, 0.0 }
 0x630   :  { %v1809_v6 = vmax.f32 %v1599_v16, 0.0 }
 0x631   :  { %v1807_v35 = vmax.f32 %v1591_v3, 0.0 }
 0x632   :  { %v3568_v41 = vpack.c.bf16 %v1809_v6, %v1808_v31 }
 0x633   :  { %v3570_v51 = vpack.c.bf16 %v1807_v35, %v1806_v34  ;;  %v2753_v54 = vpop.f32.mrb[40].mxu1 }
 0x634   :  { %v1612_v38 = vadd.f32 %v3549_v58, %v2753_v54  ;;  %v1603_v56 = vpop.f32.mrb[41].mxu1 }
 0x635   :  { %v1604_v32 = vadd.f32 %v3549_v58, %v1603_v56  ;;  %v2754_v57 = vpop.f32.mrb[42].mxu1 }
 0x636   :  { %v1615_v59 = vadd.f32 %v3549_v58, %v2754_v57  ;;  %v1606_v60 = vpop.f32.mrb[43].mxu1  ;;  %v1812_v0 = vmax.f32 %v1612_v38, 0.0 }
 0x637   :  { %v1607_v63 = vadd.f32 %v3549_v58, %v1606_v60  ;;  %v1810_v7 = vmax.f32 %v1604_v32, 0.0 }
 0x638   :  { %v1813_v1 = vmax.f32 %v1615_v59, 0.0 }
 0x639   :  { %v1811_v50 = vmax.f32 %v1607_v63, 0.0 }
 0x63a   :  { %v1867_v40 = vpack.c.bf16 %v1813_v1, %v1812_v0 }
 0x63b   :  { %v1866_v48 = vpack.c.bf16 %v1811_v50, %v1810_v7  ;;  %v2757_v8 = vpop.f32.mrb[44].mxu1 }
 0x63c   :  { %v1628_v9 = vadd.f32 %v3549_v58, %v2757_v8  ;;  %v1619_v55 = vpop.f32.mrb[45].mxu1 }
 0x63d   :  { %v1620_v10 = vadd.f32 %v3549_v58, %v1619_v55  ;;  %v2758_v11 = vpop.f32.mrb[46].mxu1  ;;  %2578 = vmatprep.subr.bf16.mxu0 %v1866_v48 }
 0x63e   :  { %v1631_v15 = vadd.f32 %v3549_v58, %v2758_v11  ;;  %v1622_v21 = vpop.f32.mrb[47].mxu1  ;;  %2579 = vmatpush3.bf16.msra.mxu0 %v3541_v37  ;;  %v1816_v61 = vmax.f32 %v1628_v9, 0.0 }
 0x63f   :  { %v1623_v23 = vadd.f32 %v3549_v58, %v1622_v21  ;;  %2580 = vmatprep.subr.bf16.mxu0 %v1867_v40  ;;  %v1814_v49 = vmax.f32 %v1620_v10, 0.0 }
 0x640   :  { %v1817_v13 = vmax.f32 %v1631_v15, 0.0 }
 0x641   :  { %v1815_v26 = vmax.f32 %v1623_v23, 0.0 }
 0x642   :  { %v1869_v42 = vpack.c.bf16 %v1817_v13, %v1816_v61  ;;  %2581 = vmatpush3.bf16.msra.mxu0 %v3539_v36 }
 0x643   :  { %v1868_v16 = vpack.c.bf16 %v1815_v26, %v1814_v49  ;;  %v2761_v17 = vpop.f32.mrb[48].mxu1 }
 0x644   :  { %v1644_v3 = vadd.f32 %v3549_v58, %v2761_v17  ;;  %v1635_v31 = vpop.f32.mrb[49].mxu1 }
 0x645   :  { %v1636_v6 = vadd.f32 %v3549_v58, %v1635_v31  ;;  %v2762_v34 = vpop.f32.mrb[50].mxu1  ;;  %2582 = vmatprep.subr.bf16.mxu0 %v1868_v16 }
 0x646   :  { %v1647_v37 = vadd.f32 %v3549_v58, %v2762_v34  ;;  %v1638_v35 = vpop.f32.mrb[51].mxu1  ;;  %2583 = vmatpush3.bf16.msra.mxu0 %v3554_v5  ;;  %v1820_v38 = vmax.f32 %v1644_v3, 0.0 }
 0x647   :  { %v1639_v54 = vadd.f32 %v3549_v58, %v1638_v35  ;;  %2584 = vmatprep.subr.bf16.mxu0 %v1869_v42  ;;  %v1818_v36 = vmax.f32 %v1636_v6, 0.0 }
 0x648   :  { %v1821_v56 = vmax.f32 %v1647_v37, 0.0 }
 0x649   :  { %v1819_v32 = vmax.f32 %v1639_v54, 0.0 }
 0x64a   :  { %v1871_v57 = vpack.c.bf16 %v1821_v56, %v1820_v38  ;;  %2585 = vmatpush3.bf16.msra.mxu0 %v3552_v2 }
 0x64b   :  { %v1870_v59 = vpack.c.bf16 %v1819_v32, %v1818_v36  ;;  %v2765_v60 = vpop.f32.mrb[52].mxu1 }
 0x64c   :  { %v1660_v63 = vadd.f32 %v3549_v58, %v2765_v60  ;;  %v1651_v0 = vpop.f32.mrb[53].mxu1 }
 0x64d   :  { %v1652_v1 = vadd.f32 %v3549_v58, %v1651_v0  ;;  %v2766_v7 = vpop.f32.mrb[54].mxu1  ;;  %2586 = vmatprep.subr.bf16.mxu0 %v1870_v59 }
 0x64e   :  { %v1663_v5 = vadd.f32 %v3549_v58, %v2766_v7  ;;  %v1654_v50 = vpop.f32.mrb[55].mxu1  ;;  %2587 = vmatpush3.bf16.msra.mxu0 %v3562_v24  ;;  %v1824_v48 = vmax.f32 %v1660_v63, 0.0 }
 0x64f   :  { %v1655_v40 = vadd.f32 %v3549_v58, %v1654_v50  ;;  %2588 = vmatprep.subr.bf16.mxu0 %v1871_v57  ;;  %v1822_v2 = vmax.f32 %v1652_v1, 0.0 }
 0x650   :  { %v1825_v8 = vmax.f32 %v1663_v5, 0.0 }
 0x651   :  { %v1823_v9 = vmax.f32 %v1655_v40, 0.0 }
 0x652   :  { %v1873_v55 = vpack.c.bf16 %v1825_v8, %v1824_v48  ;;  %2589 = vmatpush3.bf16.msra.mxu0 %v3560_v4 }
 0x653   :  { %v1872_v10 = vpack.c.bf16 %v1823_v9, %v1822_v2  ;;  %v2769_v11 = vpop.f32.mrb[56].mxu1 }
 0x654   :  { %v1676_v15 = vadd.f32 %v3549_v58, %v2769_v11  ;;  %v1667_v21 = vpop.f32.mrb[57].mxu1 }
 0x655   :  { %2590 = vmatprep.subr.bf16.mxu0 %v1872_v10  ;;  %v1668_v23 = vadd.f32 %v3549_v58, %v1667_v21  ;;  %v2770_v61 = vpop.f32.mrb[58].mxu1 }
 0x656   :  { %2591 = vmatpush3.bf16.msra.mxu0 %v3570_v51  ;;  %v1679_v24 = vadd.f32 %v3549_v58, %v2770_v61  ;;  %v1670_v13 = vpop.f32.mrb[59].mxu1  ;;  %v1828_v26 = vmax.f32 %v1676_v15, 0.0 }
 0x657   :  { %2592 = vmatprep.subr.bf16.mxu0 %v1873_v55  ;;  %v1671_v49 = vadd.f32 %v3549_v58, %v1670_v13  ;;  %v1826_v4 = vmax.f32 %v1668_v23, 0.0 }
 0x658   :  { %v1829_v42 = vmax.f32 %v1679_v24, 0.0 }
 0x659   :  { %v1827_v16 = vmax.f32 %v1671_v49, 0.0 }
 0x65a   :  { %2593 = vmatpush3.bf16.msra.mxu0 %v3568_v41  ;;  %v3600_v17 = vpack.c.bf16 %v1829_v42, %v1828_v26 }
 0x65b   :  { %v3602_v3 = vpack.c.bf16 %v1827_v16, %v1826_v4  ;;  %v2773_v31 = vpop.f32.mrb[60].mxu1 }
 0x65c   :  { %v1692_v6 = vadd.f32 %v3549_v58, %v2773_v31  ;;  %v1683_v51 = vpop.f32.mrb[61].mxu1 }
 0x65d   :  { %v1684_v34 = vadd.f32 %v3549_v58, %v1683_v51  ;;  %v2774_v37 = vpop.f32.mrb[62].mxu1  ;;  %1923 = vmatmul.mubr.bf16.vlgmr.msra.gmra.mrb[64].mxu0 %v3201_v46 }
 0x65e   :  { %v1695_v35 = vadd.f32 %v3549_v58, %v2774_v37  ;;  %v1686_v54 = vpop.f32.mrb[63].mxu1  ;;  %1962 = vmatprep.mubr.bf16.mxu0 %v3208_v33  ;;  %v1832_v38 = vmax.f32 %v1692_v6, 0.0 }
 0x65f   :  { %v1687_v41 = vadd.f32 %v3549_v58, %v1686_v54  ;;  %v1830_v36 = vmax.f32 %v1684_v34, 0.0 }
 0x660   :  { %v1833_v56 = vmax.f32 %v1695_v35, 0.0 }
 0x661   :  { %v1831_v32 = vmax.f32 %v1687_v41, 0.0 }
 0x662   :  { %v3610_v57 = vpack.c.bf16 %v1833_v56, %v1832_v38 }
 0x663   :  { %v3612_v59 = vpack.c.bf16 %v1831_v32, %v1830_v36  ;;  %v2777_v60 = vpop.f32.mrb[64].mxu1 }
 0x664   :  { %v1708_v63 = vadd.f32 %v3549_v58, %v2777_v60  ;;  %v1699_v0 = vpop.f32.mrb[65].mxu1 }
 0x665   :  { %v1700_v46 = vadd.f32 %v3549_v58, %v1699_v0  ;;  %v2778_v1 = vpop.f32.mrb[66].mxu1 }
 0x666   :  { %v1711_v7 = vadd.f32 %v3549_v58, %v2778_v1  ;;  %v1702_v33 = vpop.f32.mrb[67].mxu1  ;;  %v1836_v50 = vmax.f32 %v1708_v63, 0.0 }
 0x667   :  { %v1703_v5 = vadd.f32 %v3549_v58, %v1702_v33  ;;  %v1834_v48 = vmax.f32 %v1700_v46, 0.0 }
 0x668   :  { %v1837_v40 = vmax.f32 %v1711_v7, 0.0 }
 0x669   :  { %v1835_v8 = vmax.f32 %v1703_v5, 0.0 }
 0x66a   :  { %v3618_v2 = vpack.c.bf16 %v1837_v40, %v1836_v50 }
 0x66b   :  { %v3620_v9 = vpack.c.bf16 %v1835_v8, %v1834_v48  ;;  %v2781_v55 = vpop.f32.mrb[68].mxu1 }
 0x66c   :  { %v1724_v10 = vadd.f32 %v3549_v58, %v2781_v55  ;;  %v1715_v11 = vpop.f32.mrb[69].mxu1 }
 0x66d   :  { %v1716_v15 = vadd.f32 %v3549_v58, %v1715_v11  ;;  %v2782_v21 = vpop.f32.mrb[70].mxu1 }
 0x66e   :  { %v1727_v23 = vadd.f32 %v3549_v58, %v2782_v21  ;;  %v1718_v61 = vpop.f32.mrb[71].mxu1  ;;  %v1840_v13 = vmax.f32 %v1724_v10, 0.0 }
 0x66f   :  { %v1719_v24 = vadd.f32 %v3549_v58, %v1718_v61  ;;  %v1838_v26 = vmax.f32 %v1716_v15, 0.0 }
 0x670   :  { %v1841_v49 = vmax.f32 %v1727_v23, 0.0 }
 0x671   :  { %v1839_v42 = vmax.f32 %v1719_v24, 0.0 }
 0x672   :  { %v3626_v4 = vpack.c.bf16 %v1841_v49, %v1840_v13 }
 0x673   :  { %v3628_v16 = vpack.c.bf16 %v1839_v42, %v1838_v26  ;;  %v2785_v31 = vpop.f32.mrb[72].mxu1 }
 0x674   :  { %v1740_v6 = vadd.f32 %v3549_v58, %v2785_v31  ;;  %v1731_v51 = vpop.f32.mrb[73].mxu1 }
 0x675   :  { %v1732_v34 = vadd.f32 %v3549_v58, %v1731_v51  ;;  %v2786_v37 = vpop.f32.mrb[74].mxu1 }
 0x676   :  { %v1743_v35 = vadd.f32 %v3549_v58, %v2786_v37  ;;  %v1734_v54 = vpop.f32.mrb[75].mxu1  ;;  %v1844_v38 = vmax.f32 %v1740_v6, 0.0 }
 0x677   :  { %v1735_v41 = vadd.f32 %v3549_v58, %v1734_v54  ;;  %v1842_v36 = vmax.f32 %v1732_v34, 0.0 }
 0x678   :  { %v1845_v56 = vmax.f32 %v1743_v35, 0.0 }
 0x679   :  { %v1843_v32 = vmax.f32 %v1735_v41, 0.0 }
 0x67a   :  { %v1883_v60 = vpack.c.bf16 %v1845_v56, %v1844_v38 }
 0x67b   :  { %v1882_v63 = vpack.c.bf16 %v1843_v32, %v1842_v36  ;;  %v2789_v0 = vpop.f32.mrb[76].mxu1 }
 0x67c   :  { %v1756_v46 = vadd.f32 %v3549_v58, %v2789_v0  ;;  %v1747_v1 = vpop.f32.mrb[77].mxu1 }
 0x67d   :  { %v1748_v7 = vadd.f32 %v3549_v58, %v1747_v1  ;;  %v2790_v33 = vpop.f32.mrb[78].mxu1  ;;  %2600 = vmatprep.subr.bf16.mxu0 %v1882_v63 }
 0x67e   :  { %v1759_v5 = vadd.f32 %v3549_v58, %v2790_v33  ;;  %v1750_v50 = vpop.f32.mrb[79].mxu1  ;;  %2601 = vmatpush3.bf16.msra.mxu0 %v3602_v3  ;;  %v1848_v48 = vmax.f32 %v1756_v46, 0.0 }
 0x67f   :  { %v1751_v40 = vadd.f32 %v3549_v58, %v1750_v50  ;;  %2602 = vmatprep.subr.bf16.mxu0 %v1883_v60  ;;  %v1846_v55 = vmax.f32 %v1748_v7, 0.0 }
 0x680   :  { %v1849_v8 = vmax.f32 %v1759_v5, 0.0 }
 0x681   :  { %v1847_v10 = vmax.f32 %v1751_v40, 0.0 }
 0x682   :  { %v1885_v11 = vpack.c.bf16 %v1849_v8, %v1848_v48  ;;  %2603 = vmatpush3.bf16.msra.mxu0 %v3600_v17 }
 0x683   :  { %v1884_v15 = vpack.c.bf16 %v1847_v10, %v1846_v55  ;;  %v2793_v21 = vpop.f32.mrb[80].mxu1 }
 0x684   :  { %v1772_v23 = vadd.f32 %v3549_v58, %v2793_v21  ;;  %v1763_v61 = vpop.f32.mrb[81].mxu1 }
 0x685   :  { %v1764_v24 = vadd.f32 %v3549_v58, %v1763_v61  ;;  %v2794_v13 = vpop.f32.mrb[82].mxu1  ;;  %2604 = vmatprep.subr.bf16.mxu0 %v1884_v15 }
 0x686   :  { %v1775_v3 = vadd.f32 %v3549_v58, %v2794_v13  ;;  %v1766_v49 = vpop.f32.mrb[83].mxu1  ;;  %2605 = vmatpush3.bf16.msra.mxu0 %v3612_v59  ;;  %v1852_v42 = vmax.f32 %v1772_v23, 0.0 }
 0x687   :  { %v1767_v26 = vadd.f32 %v3549_v58, %v1766_v49  ;;  %2606 = vmatprep.subr.bf16.mxu0 %v1885_v11  ;;  %v1850_v17 = vmax.f32 %v1764_v24, 0.0 }
 0x688   :  { %v1853_v31 = vmax.f32 %v1775_v3, 0.0 }
 0x689   :  { %v1851_v6 = vmax.f32 %v1767_v26, 0.0 }
 0x68a   :  { %v1887_v51 = vpack.c.bf16 %v1853_v31, %v1852_v42  ;;  %2607 = vmatpush3.bf16.msra.mxu0 %v3610_v57 }
 0x68b   :  { %v1886_v34 = vpack.c.bf16 %v1851_v6, %v1850_v17  ;;  %v2797_v37 = vpop.f32.mrb[84].mxu1 }
 0x68c   :  { %v1788_v35 = vadd.f32 %v3549_v58, %v2797_v37  ;;  %v1779_v54 = vpop.f32.mrb[85].mxu1 }
 0x68d   :  { %v1780_v41 = vadd.f32 %v3549_v58, %v1779_v54  ;;  %v2798_v38 = vpop.f32.mrb[86].mxu1  ;;  %2608 = vmatprep.subr.bf16.mxu0 %v1886_v34 }
 0x68e   :  { %v1791_v59 = vadd.f32 %v3549_v58, %v2798_v38  ;;  %v1782_v56 = vpop.f32.mrb[87].mxu1  ;;  %2609 = vmatpush3.bf16.msra.mxu0 %v3620_v9  ;;  %v1856_v32 = vmax.f32 %v1788_v35, 0.0 }
 0x68f   :  { %v1783_v36 = vadd.f32 %v3549_v58, %v1782_v56  ;;  %2610 = vmatprep.subr.bf16.mxu0 %v1887_v51  ;;  %v1854_v57 = vmax.f32 %v1780_v41, 0.0 }
 0x690   :  { %v1857_v60 = vmax.f32 %v1791_v59, 0.0 }
 0x691   :  { %v1855_v63 = vmax.f32 %v1783_v36, 0.0 }
 0x692   :  { %v1889_v0 = vpack.c.bf16 %v1857_v60, %v1856_v32  ;;  %2611 = vmatpush3.bf16.msra.mxu0 %v3618_v2 }
 0x693   :  { %v1888_v46 = vpack.c.bf16 %v1855_v63, %v1854_v57 }
 0x695   :  { %2612 = vmatprep.subr.bf16.mxu0 %v1888_v46 }
 0x696   :  { %2613 = vmatpush3.bf16.msra.mxu0 %v3628_v16 }
 0x697   :  { %2614 = vmatprep.subr.bf16.mxu0 %v1889_v0 }
 0x69a   :  { %2615 = vmatpush3.bf16.msra.mxu0 %v3626_v4 }
 0x69b   :  { %2799 = vmatprep.subr.bf16.mxu0 %v2928_v30 }
 0x69d   :  { %1963 = vmatmul.mubr.bf16.vlgmr.msra.gmra.mrb[68].mxu0 %v3263_v29 }
 0x69e   :  { %2800 = vmatpush3.bf16.msra.mxu0 %v3270_v53  ;;  %2803 = vmatprep.mubr.msk.bf16.mxu0 %vm2929_vm3, %v2928_v30 }
 0x69f   :  { %2801 = vmatprep.subr.bf16.mxu0 %v2928_v30 }
 0x6a2   :  { %2802 = vmatpush3.bf16.msra.mxu0 %v3278_v18 }
 0x6a3   :  { %2807 = vmatprep.subr.bf16.mxu0 %v2928_v30 }
 0x730   :  { %v2594_v58 = vpop.f32.mrb[64].mxu0 }
 0x731   :  { %v2595_v2 = vpop.f32.mrb[65].mxu0 }
 0x732   :  { %v2596_v9 = vadd.f32 %v2595_v2, %v2594_v58  ;;  %v2597_v16 = vpop.f32.mrb[66].mxu0 }
 0x733   :  { %v2598_v4 = vpop.f32.mrb[67].mxu0 }
 0x770   :  { %v2616_v1 = vpop.f32.mrb[68].mxu0 }
 0x771   :  { %v2617_v7 = vpop.f32.mrb[69].mxu0 }
 0x772   :  { %v2618_v33 = vadd.f32 %v2617_v7, %v2616_v1  ;;  %v2619_v29 = vpop.f32.mrb[70].mxu0 }
 0x773   :  { %v2620_v5 = vpop.f32.mrb[71].mxu0 }
 0x774   :  { %v1965_v53 = vadd.f32 %v2618_v33, %v2596_v9 }
 0x776   :  { %v1970_v50 = vpack.c.bf16 %v1965_v53, %v1965_v53 }
 0x778   :  { %2804 = vmatmul.mubr.msk.bf16.vlgmr.msra.gmra.mrb[72].mxu0 %vm889_vm4, %v1970_v50 }
 0x779   :  { %2808 = vmatpush3.bf16.msra.mxu0 %v3290_v43  ;;  %2811 = vmatprep.mubr.msk.bf16.mxu0 %vm2929_vm3, %v2928_v30 }
 0x77a   :  { %2809 = vmatprep.subr.bf16.mxu0 %v2928_v30 }
 0x77d   :  { %2810 = vmatpush3.bf16.msra.mxu0 %v3297_v44 }
 0x77e   :  { %2815 = vmatprep.subr.bf16.mxu0 %v2928_v30 }
 0x84b   :  { %v2008_v18 = vpop.f32.mrb[72].mxu0 }
 0x84c   :  { %v2009_v40 = vadd.f32 %v2008_v18, %v3309_v52  ;;  %v2805_v48 = vpop.f32.mrb[73].mxu0 }
 0x84d   :  { %v2011_v8 = vpop.f32.mrb[74].mxu0 }
 0x84e   :  { %v2014_v55 = vsel %vm889_vm4, %v2009_v40, 0.0  ;;  %v2806_v10 = vpop.f32.mrb[75].mxu0 }
 0x84f   :  { %v2015_v11 = vrot.slane %v2014_v55, 4 }
 0x851   :  { %v2016_v15 = vadd.f32 %v2015_v11, %v2014_v55 }
 0x853   :  { %v2017_v43 = vrot.slane %v2016_v15, 2 }
 0x855   :  { %v2018_v21 = vadd.f32 %v2017_v43, %v2016_v15 }
 0x857   :  { %v2019_v23 = vrot.slane %v2018_v21, 1 }
 0x859   :  { %v2020_v61 = vadd.f32 %v2019_v23, %v2018_v21  ;;  %v2211_v21 = vpop.xlane.xlu1 %2210 }
 0x85b   :  { %v2021_v24 = vmul.f32 0.125, %v2020_v61  ;;  %v2197_v61 = vpop.xlane.xlu0 %2196 }
 0x85d   :  { %v2022_v13 = vsub.f32 %v2009_v40, %v2021_v24 }
 0x85f   :  { %v2023_v3 = vmul.f32 %v2022_v13, %v2022_v13 }
 0x861   :  { %v2024_v44 = vsel %vm889_vm4, %v2023_v3, 0.0 }
 0x862   :  { %v2025_v49 = vrot.slane %v2024_v44, 4 }
 0x864   :  { %v2026_v26 = vadd.f32 %v2025_v49, %v2024_v44 }
 0x866   :  { %v2027_v42 = vrot.slane %v2026_v26, 2 }
 0x868   :  { %v2028_v52 = vadd.f32 %v2027_v42, %v2026_v26 }
 0x86a   :  { %v2029_v31 = vrot.slane %v2028_v52, 1 }
 0x86c   :  { %v2030_v17 = vadd.f32 %v2029_v31, %v2028_v52 }
 0x86e   :  { %v2031_v6 = vmul.f32 0.125, %v2030_v17 }
 0x870   :  { %v2032_v51 = vadd.f32 1e-05, %v2031_v6 }
 0x872   :  { %2913 = vrsqrt.f32 %v2032_v51 }
 0x87c   :  { %v2914_v34 = vpop.eup %2913 }
 0x87d   :  { %v2034_v37 = vmul.f32 %v2914_v34, %v2022_v13  ;;  %v2198_v13 = vmax.f32 %v2197_v61, 1e-24 }
 0x87f   :  { %v2035_v35 = vmul.f32 %v2034_v37, %v3318_v20  ;;  %v2212_v37 = vmax.f32 %v2211_v21, 1e-24 }
 0x881   :  { %v2036_v54 = vadd.f32 %v2035_v35, %v3322_v22 }
 0x883   :  { %v2037_v41 = vmax.f32 %v2036_v54, 0.0 }
 0x885   :  { %v2038_v38 = vpack.c.bf16 %v2037_v41, %v2037_v41 }
 0x887   :  { %2812 = vmatmul.mubr.msk.bf16.vlgmr.msra.gmra.mrb[76].mxu0 %vm889_vm4, %v2038_v38 }
 0x888   :  { %2816 = vmatpush3.bf16.msra.mxu0 %v3332_v25  ;;  %2817 = vmatprep.mubr.msk.bf16.mxu0 %vm2929_vm3, %v2928_v30 }
 0x889   :  { %2821 = vmatprep.subr.bf16.mxu0 %v2928_v30 }
 0x95a   :  { %v2076_v59 = vpop.f32.mrb[76].mxu0 }
 0x95b   :  { %v2077_v56 = vadd.f32 %v2076_v59, %v3339_v28  ;;  %v2813_v36 = vpop.f32.mrb[77].mxu0 }
 0x95c   :  { %v2079_v32 = vpop.f32.mrb[78].mxu0 }
 0x95d   :  { %v2082_v60 = vpack.c.bf16 %v2077_v56, %v2077_v56  ;;  %v2814_v20 = vpop.f32.mrb[79].mxu0  ;;  %v2215_v57 = vmul.f32 %v2077_v56, %v2077_v56 }
 0x95f   :  { %2818 = vmatmul.mubr.msk.bf16.vlgmr.msra.gmra.mrb[80].mxu0 %vm1044_vm5, %v2082_v60  ;;  %v2216_v22 = vsel %vm1044_vm5, %v2215_v57, 0.0 }
 0x960   :  { %2217 = vadd.xlane.f32.xlu1 %v2216_v22  ;;  %2822 = vmatpush3.bf16.msra.mxu0 %v3355_v19 }
 0x961   :  { %2823 = vmatprep.subr.bf16.mxu0 %v2928_v30  ;;  %2825 = vmatprep.mubr.msk.bf16.mxu0 %vm2929_vm3, %v2928_v30 }
 0x964   :  { %2824 = vmatpush3.bf16.msra.mxu0 %v3362_v39 }
 0x9ed   :  { %v2218_v23 = vpop.xlane.xlu1 %2217 }
 0x9ee   :  { %v2219_v24 = vmax.f32 %v2218_v23, 1e-24 }
 0xa32   :  { %v2120_v25 = vpop.f32.mrb[80].mxu0 }
 0xa33   :  { %v2121_v28 = vadd.f32 %v2120_v25, %v3376_v45  ;;  %v2819_v63 = vpop.f32.mrb[81].mxu0 }
 0xa34   :  { %v2123_v0 = vpop.f32.mrb[82].mxu0 }
 0xa35   :  { %v2126_v46 = vsel %vm889_vm4, %v2121_v28, 0.0  ;;  %v2820_v58 = vpop.f32.mrb[83].mxu0 }
 0xa36   :  { %v2127_v2 = vrot.slane %v2126_v46, 4 }
 0xa38   :  { %v2128_v9 = vadd.f32 %v2127_v2, %v2126_v46 }
 0xa3a   :  { %v2129_v16 = vrot.slane %v2128_v9, 2 }
 0xa3c   :  { %v2130_v4 = vadd.f32 %v2129_v16, %v2128_v9 }
 0xa3e   :  { %v2131_v19 = vrot.slane %v2130_v4, 1 }
 0xa40   :  { %v2132_v1 = vadd.f32 %v2131_v19, %v2130_v4 }
 0xa42   :  { %v2133_v7 = vmul.f32 0.125, %v2132_v1 }
 0xa44   :  { %v2134_v33 = vsub.f32 %v2121_v28, %v2133_v7 }
 0xa46   :  { %v2135_v29 = vmul.f32 %v2134_v33, %v2134_v33 }
 0xa48   :  { %v2136_v30 = vsel %vm889_vm4, %v2135_v29, 0.0 }
 0xa49   :  { %v2137_v39 = vrot.slane %v2136_v30, 4 }
 0xa4b   :  { %v2138_v5 = vadd.f32 %v2137_v39, %v2136_v30 }
 0xa4d   :  { %v2139_v53 = vrot.slane %v2138_v5, 2 }
 0xa4f   :  { %v2140_v45 = vadd.f32 %v2139_v53, %v2138_v5 }
 0xa51   :  { %v2141_v50 = vrot.slane %v2140_v45, 1 }
 0xa53   :  { %v2142_v18 = vadd.f32 %v2141_v50, %v2140_v45 }
 0xa55   :  { %v2143_v40 = vmul.f32 0.125, %v2142_v18 }
 0xa57   :  { %v2144_v48 = vadd.f32 1e-05, %v2143_v40 }
 0xa59   :  { %2915 = vrsqrt.f32 %v2144_v48 }
 0xa5a   :  { %2917 = vrsqrt.f32 %v2219_v24 }
 0xa5b   :  { %2919 = vrsqrt.f32 %v2198_v13 }
 0xa5c   :  { %2921 = vrsqrt.f32 %v2212_v37 }
 0xa63   :  { %v2916_v8 = vpop.eup %2915 }
 0xa64   :  { %v2146_v55 = vmul.f32 %v2916_v8, %v2134_v33  ;;  %v2918_v3 = vpop.eup %2917 }
 0xa65   :  { %v2920_v44 = vpop.eup %2919 }
 0xa66   :  { %v2147_v10 = vmul.f32 %v2146_v55, %v3384_v14  ;;  %v2221_v14 = vmul.f32 %v2918_v3, %v2077_v56  ;;  %v2200_v17 = vmul.f32 %v2920_v44, %v3530_v12 }
 0xa68   :  { %v2148_v11 = vadd.f32 %v2147_v10, %v3389_v62  ;;  %v2222_v51 = vmul.f32 %v2221_v14, %v2200_v17 }
 0xa6a   :  { %v2149_v15 = vmax.f32 %v2148_v11, 0.0  ;;  %v2223_v34 = vsel %vm1044_vm5, %v2222_v51, 0.0 }
 0xa6c   :  { %v2150_v43 = vpack.c.bf16 %v2149_v15, %v2149_v15 }
 0xa6e   :  { %2826 = vmatmul.mubr.msk.bf16.vlgmr.msra.gmra.mrb[84].mxu0 %vm889_vm4, %v2150_v43 }
 0xb41   :  { %v2188_v49 = vpop.f32.mrb[84].mxu0 }
 0xb42   :  { %v2189_v26 = vadd.f32 %v2188_v49, %v3527_v47  ;;  %v2827_v42 = vpop.f32.mrb[85].mxu0  ;;  %v2922_v47 = vpop.eup %2921 }
 0xb43   :  { %v2191_v52 = vpop.f32.mrb[86].mxu0  ;;  %v2214_v59 = vmul.f32 %v2922_v47, %v3342_v27 }
 0xb44   :  { %v2828_v62 = vpop.f32.mrb[87].mxu0  ;;  %v2201_v31 = vmul.f32 %v2189_v26, %v2189_v26 }
 0xb46   :  { %v2202_v6 = vsel %vm1044_vm5, %v2201_v31, 0.0 }
 0xb47   :  { %2203 = vadd.xlane.f32.xlu0 %v2202_v6 }
 0xb4b   :  { %2224 = vadd.xlane.f32.xlu0 %v2223_v34 }
 0xbd4   :  { %v2204_v35 = vpop.xlane.xlu0 %2203 }
 0xbd5   :  { %v2205_v54 = vmax.f32 %v2204_v35, 1e-24 }
 0xbd7   :  { %2923 = vrsqrt.f32 %v2205_v54 }
 0xbd8   :  { %v2225_v36 = vpop.xlane.xlu0 %2224 }
 0xbd9   :  { %v2226_v32 = vmul.f32 2.0, %v2225_v36 }
 0xbdb   :  { %v2227_v57 = vsub.f32 2.0, %v2226_v32 }
 0xbe1   :  { %v2924_v41 = vpop.eup %2923 }
 0xbe2   :  { %v2207_v38 = vmul.f32 %v2924_v41, %v2189_v26 }
 0xbe4   :  { %v2228_v56 = vmul.f32 %v2214_v59, %v2207_v38 }
 0xbe6   :  { %v2229_v12 = vsel %vm1044_vm5, %v2228_v56, 0.0 }
 0xbe7   :  { %2230 = vadd.xlane.f32.xlu1 %v2229_v12 }
 0xc74   :  { %v2231_v60 = vpop.xlane.xlu1 %2230 }
 0xc75   :  { %v2232_v20 = vmul.f32 2.0, %v2231_v60 }
 0xc77   :  { %v2233_v22 = vsub.f32 2.0, %v2232_v20 }
 0xc79   :  { %v2234_v25 = vadd.f32 %v2233_v22, %v2227_v57 }
 0xc7b   :  { %2236 = vst.msk [vmem:[%s3712_s10] sm:$0xff] %vm2235_vm6, %v2234_v25 }

</bundles_post_ra>
